<compile_context>
chip_gen: v5e
topology: v5e:2x2
jax: 0.10.0
libtpu: 0.0.40
codegen_flags: <defaults>
</compile_context>

<pallas_src>
import functools

import jax
import jax.numpy as jnp
import numpy as np
from jax.experimental import pallas as pl
from jax.experimental.pallas import tpu as pltpu


def _corr_kernel(x1_ref, x2_ref, mask_ref, out_ref, *, C, D, HD, max_disp):
    """One grid step handles one batch element.

    x1_ref  : (1, C, S)  VMEM, S = W*H*D (lane-dense)
    x2_ref  : (1, C, S)  VMEM
    mask_ref: (K, S)     VMEM f32, precomputed boundary-validity mask
    out_ref : (1, K, S)  VMEM, K = (2*max_disp+1)**3
    """
    S = x1_ref.shape[-1]
    R = 2 * max_disp + 1

    def rolled(a, shift):
        # circular roll along lanes; static non-negative shift
        shift = shift % S
        if shift == 0:
            return a
        return pltpu.roll(a, shift, axis=1)

    def stack_shifts(block, step):
        # Stack (2*max_disp+1) copies of `block` along sublanes, ordered
        # s = -max_disp .. +max_disp; copy s reads source position p + s*step
        # (wrap-around positions are zeroed by the mask at the end).
        return jnp.concatenate(
            [rolled(block, -s * step) for s in range(-max_disp, max_disp + 1)],
            axis=0)

    # ---- hoisted out of the channel loop -------------------------------
    x1s = x1_ref[0].astype(jnp.float32) * jnp.float32(1.0 / C)   # (C, S)
    x2f = x2_ref[0].astype(jnp.float32)                          # (C, S)

    # ---- channel-outer dense accumulation into a (K, S) block ----------
    acc = None
    for c in range(C):                      # unrolled; C is small
        row = x2f[c:c + 1, :]               # (1, S)
        zs = stack_shifts(row, 1)           # (R,    S)   d-shifts
        ys = stack_shifts(zs, D)            # (R**2, S)   (h, d)-shifts
        ws = stack_shifts(ys, HD)           # (R**3, S) = (K, S)  (w, h, d)
        term = x1s[c:c + 1, :] * ws         # dense (K, S) VPU multiply
        acc = term if acc is None else acc + term

    # one dense masked store (row order matches the torch meshgrid 'ij' order)
    out_ref[0] = (acc * mask_ref[...]).astype(out_ref.dtype)


def correlation(x_1, x_2, max_disp=1):
    """Pallas equivalent of Correlation.forward (kernel_size=1, stride=1)."""
    assert x_1.shape == x_2.shape and x_1.ndim == 5
    N, C, W, H, D = x_1.shape
    S = W * H * D
    HD = H * D
    R = 2 * max_disp + 1
    K = R ** 3

    # offsets in the same order as the PyTorch meshgrid loop (dx, dy, dz)
    rng = range(-max_disp, max_disp + 1)
    offsets = [(sx, sy, sz) for sx in rng for sy in rng for sz in rng]

    # (K, S) boundary-validity mask, precomputed once as a host constant
    pos = np.arange(S)
    w_idx = pos // HD
    h_idx = (pos // D) % H
    d_idx = pos % D
    mask_np = np.stack([
        ((w_idx + sx >= 0) & (w_idx + sx < W) &
         (h_idx + sy >= 0) & (h_idx + sy < H) &
         (d_idx + sz >= 0) & (d_idx + sz < D)).astype(np.float32)
        for (sx, sy, sz) in offsets])
    mask = jnp.asarray(mask_np)                              # (K, S) f32

    # lane-dense re-layout (wrapper-side plumbing only)
    x1f = x_1.reshape(N, C, S)
    x2f = x_2.reshape(N, C, S)

    kernel = functools.partial(_corr_kernel, C=C, D=D, HD=HD, max_disp=max_disp)

    itemsize = x_1.dtype.itemsize
    cost = pl.CostEstimate(
        flops=2 * N * K * C * S + N * K * S,
        transcendentals=0,
        bytes_accessed=(2 * N * C * S + N * K * S) * itemsize + K * S * 4,
    )

    out_flat = pl.pallas_call(
        kernel,
        out_shape=jax.ShapeDtypeStruct((N, K, S), x_1.dtype),
        grid=(N,),
        in_specs=[
            pl.BlockSpec((1, C, S), lambda n: (n, 0, 0)),
            pl.BlockSpec((1, C, S), lambda n: (n, 0, 0)),
            pl.BlockSpec((K, S), lambda n: (0, 0)),   # broadcast block: fetched once
        ],
        out_specs=pl.BlockSpec((1, K, S), lambda n: (n, 0, 0)),
        compiler_params=pltpu.CompilerParams(
            dimension_semantics=("parallel",),
        ),
        cost_estimate=cost,
    )(x1f, x2f, mask)

    return out_flat.reshape(N, K, W, H, D)


def _reference(x_1, x_2, max_disp=1):
    """Plain-JAX reference mirroring the PyTorch forward_run."""
    p = max_disp
    N, C, W, H, D = x_1.shape
    x_2p = jnp.pad(x_2, ((0, 0), (0, 0), (p, p), (p, p), (p, p)))
    outs = []
    for dx in range(2 * p + 1):
        for dy in range(2 * p + 1):
            for dz in range(2 * p + 1):
                win = x_2p[:, :, dx:dx + W, dy:dy + H, dz:dz + D]
                outs.append(jnp.mean(x_1 * win, axis=1, keepdims=True))
    return jnp.concatenate(outs, axis=1)


if __name__ == "__main__":
    key = jax.random.PRNGKey(0)
    k1, k2 = jax.random.split(key)
    # Small shapes consistent with the module: (N, C, W, H, D)
    N, C, W, H, D = 2, 4, 8, 8, 8
    x_1 = jax.random.normal(k1, (N, C, W, H, D), dtype=jnp.float32)
    x_2 = jax.random.normal(k2, (N, C, W, H, D), dtype=jnp.float32)

    out = correlation(x_1, x_2, max_disp=1)
    out = jax.block_until_ready(out)

    ref = _reference(x_1, x_2, max_disp=1)
    assert out.shape == (N, 27, W, H, D), out.shape
    np.testing.assert_allclose(np.asarray(out), np.asarray(ref),
                               rtol=1e-5, atol=1e-5)
    print("KERNEL_OK")
</pallas_src>

<mosaic_0001>
module attributes {stable_mosaic.version = 11 : i64} {
  func.func @_corr_kernel(%arg0: i32, %arg1: memref<1x4x512xf32, #tpu.memory_space<vmem>>, %arg2: memref<1x4x512xf32, #tpu.memory_space<vmem>>, %arg3: memref<27x512xf32, #tpu.memory_space<vmem>>, %arg4: memref<1x27x512xf32, #tpu.memory_space<vmem>>) attributes {dimension_semantics = [#tpu.dimension_semantics<parallel>], iteration_bounds = array<i64: 2>, scalar_prefetch = 0 : i64, scratch_operands = 0 : i64, tpu.core_type = #tpu.core_type<tc>, window_params = [{transform_indices = @transform_0, window_bounds = array<i64: 1, 4, 512>}, {transform_indices = @transform_1, window_bounds = array<i64: 1, 4, 512>}, {pipeline_mode = #tpu.pipeline_mode<synchronous>, transform_indices = @transform_2, window_bounds = array<i64: 27, 512>}, {transform_indices = @transform_3, window_bounds = array<i64: 1, 27, 512>}]} {
    %c0 = arith.constant 0 : index
    %c0_0 = arith.constant 0 : index
    %c0_1 = arith.constant 0 : index
    %0 = vector.load %arg1[%c0, %c0_0, %c0_1] : memref<1x4x512xf32, #tpu.memory_space<vmem>>, vector<1x4x512xf32>
    %1 = vector.shape_cast %0 : vector<1x4x512xf32> to vector<4x512xf32>
    %cst = arith.constant 2.500000e-01 : f32
    %2 = vector.broadcast %cst : f32 to vector<4x512xf32>
    %3 = arith.mulf %1, %2 : vector<4x512xf32>
    %c0_2 = arith.constant 0 : index
    %c0_3 = arith.constant 0 : index
    %c0_4 = arith.constant 0 : index
    %4 = vector.load %arg2[%c0_2, %c0_3, %c0_4] : memref<1x4x512xf32, #tpu.memory_space<vmem>>, vector<1x4x512xf32>
    %5 = vector.shape_cast %4 : vector<1x4x512xf32> to vector<4x512xf32>
    %6 = vector.extract_strided_slice %5 {offsets = [0, 0], sizes = [1, 512], strides = [1, 1]} : vector<4x512xf32> to vector<1x512xf32>
    %c1_i32 = arith.constant 1 : i32
    %7 = tpu.dynamic_rotate %6 by %c1_i32 dim 1 : vector<1x512xf32>, i32 -> vector<1x512xf32>
    %c511_i32 = arith.constant 511 : i32
    %8 = tpu.dynamic_rotate %6 by %c511_i32 dim 1 : vector<1x512xf32>, i32 -> vector<1x512xf32>
    %9 = tpu.concatenate %7, %6, %8 in 0 : vector<1x512xf32>, vector<1x512xf32>, vector<1x512xf32> -> vector<3x512xf32>
    %c8_i32 = arith.constant 8 : i32
    %10 = tpu.dynamic_rotate %9 by %c8_i32 dim 1 : vector<3x512xf32>, i32 -> vector<3x512xf32>
    %c504_i32 = arith.constant 504 : i32
    %11 = tpu.dynamic_rotate %9 by %c504_i32 dim 1 : vector<3x512xf32>, i32 -> vector<3x512xf32>
    %12 = tpu.concatenate %10, %9, %11 in 0 : vector<3x512xf32>, vector<3x512xf32>, vector<3x512xf32> -> vector<9x512xf32>
    %c64_i32 = arith.constant 64 : i32
    %13 = tpu.dynamic_rotate %12 by %c64_i32 dim 1 : vector<9x512xf32>, i32 -> vector<9x512xf32>
    %c448_i32 = arith.constant 448 : i32
    %14 = tpu.dynamic_rotate %12 by %c448_i32 dim 1 : vector<9x512xf32>, i32 -> vector<9x512xf32>
    %15 = tpu.concatenate %13, %12, %14 in 0 : vector<9x512xf32>, vector<9x512xf32>, vector<9x512xf32> -> vector<27x512xf32>
    %16 = vector.extract_strided_slice %3 {offsets = [0, 0], sizes = [1, 512], strides = [1, 1]} : vector<4x512xf32> to vector<1x512xf32>
    %17 = vector.broadcast %16 : vector<1x512xf32> to vector<27x512xf32>
    %18 = arith.mulf %17, %15 : vector<27x512xf32>
    %19 = vector.extract_strided_slice %5 {offsets = [1, 0], sizes = [1, 512], strides = [1, 1]} : vector<4x512xf32> to vector<1x512xf32>
    %c1_i32_5 = arith.constant 1 : i32
    %20 = tpu.dynamic_rotate %19 by %c1_i32_5 dim 1 : vector<1x512xf32>, i32 -> vector<1x512xf32>
    %c511_i32_6 = arith.constant 511 : i32
    %21 = tpu.dynamic_rotate %19 by %c511_i32_6 dim 1 : vector<1x512xf32>, i32 -> vector<1x512xf32>
    %22 = tpu.concatenate %20, %19, %21 in 0 : vector<1x512xf32>, vector<1x512xf32>, vector<1x512xf32> -> vector<3x512xf32>
    %c8_i32_7 = arith.constant 8 : i32
    %23 = tpu.dynamic_rotate %22 by %c8_i32_7 dim 1 : vector<3x512xf32>, i32 -> vector<3x512xf32>
    %c504_i32_8 = arith.constant 504 : i32
    %24 = tpu.dynamic_rotate %22 by %c504_i32_8 dim 1 : vector<3x512xf32>, i32 -> vector<3x512xf32>
    %25 = tpu.concatenate %23, %22, %24 in 0 : vector<3x512xf32>, vector<3x512xf32>, vector<3x512xf32> -> vector<9x512xf32>
    %c64_i32_9 = arith.constant 64 : i32
    %26 = tpu.dynamic_rotate %25 by %c64_i32_9 dim 1 : vector<9x512xf32>, i32 -> vector<9x512xf32>
    %c448_i32_10 = arith.constant 448 : i32
    %27 = tpu.dynamic_rotate %25 by %c448_i32_10 dim 1 : vector<9x512xf32>, i32 -> vector<9x512xf32>
    %28 = tpu.concatenate %26, %25, %27 in 0 : vector<9x512xf32>, vector<9x512xf32>, vector<9x512xf32> -> vector<27x512xf32>
    %29 = vector.extract_strided_slice %3 {offsets = [1, 0], sizes = [1, 512], strides = [1, 1]} : vector<4x512xf32> to vector<1x512xf32>
    %30 = vector.broadcast %29 : vector<1x512xf32> to vector<27x512xf32>
    %31 = arith.mulf %30, %28 : vector<27x512xf32>
    %32 = arith.addf %18, %31 : vector<27x512xf32>
    %33 = vector.extract_strided_slice %5 {offsets = [2, 0], sizes = [1, 512], strides = [1, 1]} : vector<4x512xf32> to vector<1x512xf32>
    %c1_i32_11 = arith.constant 1 : i32
    %34 = tpu.dynamic_rotate %33 by %c1_i32_11 dim 1 : vector<1x512xf32>, i32 -> vector<1x512xf32>
    %c511_i32_12 = arith.constant 511 : i32
    %35 = tpu.dynamic_rotate %33 by %c511_i32_12 dim 1 : vector<1x512xf32>, i32 -> vector<1x512xf32>
    %36 = tpu.concatenate %34, %33, %35 in 0 : vector<1x512xf32>, vector<1x512xf32>, vector<1x512xf32> -> vector<3x512xf32>
    %c8_i32_13 = arith.constant 8 : i32
    %37 = tpu.dynamic_rotate %36 by %c8_i32_13 dim 1 : vector<3x512xf32>, i32 -> vector<3x512xf32>
    %c504_i32_14 = arith.constant 504 : i32
    %38 = tpu.dynamic_rotate %36 by %c504_i32_14 dim 1 : vector<3x512xf32>, i32 -> vector<3x512xf32>
    %39 = tpu.concatenate %37, %36, %38 in 0 : vector<3x512xf32>, vector<3x512xf32>, vector<3x512xf32> -> vector<9x512xf32>
    %c64_i32_15 = arith.constant 64 : i32
    %40 = tpu.dynamic_rotate %39 by %c64_i32_15 dim 1 : vector<9x512xf32>, i32 -> vector<9x512xf32>
    %c448_i32_16 = arith.constant 448 : i32
    %41 = tpu.dynamic_rotate %39 by %c448_i32_16 dim 1 : vector<9x512xf32>, i32 -> vector<9x512xf32>
    %42 = tpu.concatenate %40, %39, %41 in 0 : vector<9x512xf32>, vector<9x512xf32>, vector<9x512xf32> -> vector<27x512xf32>
    %43 = vector.extract_strided_slice %3 {offsets = [2, 0], sizes = [1, 512], strides = [1, 1]} : vector<4x512xf32> to vector<1x512xf32>
    %44 = vector.broadcast %43 : vector<1x512xf32> to vector<27x512xf32>
    %45 = arith.mulf %44, %42 : vector<27x512xf32>
    %46 = arith.addf %32, %45 : vector<27x512xf32>
    %47 = vector.extract_strided_slice %5 {offsets = [3, 0], sizes = [1, 512], strides = [1, 1]} : vector<4x512xf32> to vector<1x512xf32>
    %c1_i32_17 = arith.constant 1 : i32
    %48 = tpu.dynamic_rotate %47 by %c1_i32_17 dim 1 : vector<1x512xf32>, i32 -> vector<1x512xf32>
    %c511_i32_18 = arith.constant 511 : i32
    %49 = tpu.dynamic_rotate %47 by %c511_i32_18 dim 1 : vector<1x512xf32>, i32 -> vector<1x512xf32>
    %50 = tpu.concatenate %48, %47, %49 in 0 : vector<1x512xf32>, vector<1x512xf32>, vector<1x512xf32> -> vector<3x512xf32>
    %c8_i32_19 = arith.constant 8 : i32
    %51 = tpu.dynamic_rotate %50 by %c8_i32_19 dim 1 : vector<3x512xf32>, i32 -> vector<3x512xf32>
    %c504_i32_20 = arith.constant 504 : i32
    %52 = tpu.dynamic_rotate %50 by %c504_i32_20 dim 1 : vector<3x512xf32>, i32 -> vector<3x512xf32>
    %53 = tpu.concatenate %51, %50, %52 in 0 : vector<3x512xf32>, vector<3x512xf32>, vector<3x512xf32> -> vector<9x512xf32>
    %c64_i32_21 = arith.constant 64 : i32
    %54 = tpu.dynamic_rotate %53 by %c64_i32_21 dim 1 : vector<9x512xf32>, i32 -> vector<9x512xf32>
    %c448_i32_22 = arith.constant 448 : i32
    %55 = tpu.dynamic_rotate %53 by %c448_i32_22 dim 1 : vector<9x512xf32>, i32 -> vector<9x512xf32>
    %56 = tpu.concatenate %54, %53, %55 in 0 : vector<9x512xf32>, vector<9x512xf32>, vector<9x512xf32> -> vector<27x512xf32>
    %57 = vector.extract_strided_slice %3 {offsets = [3, 0], sizes = [1, 512], strides = [1, 1]} : vector<4x512xf32> to vector<1x512xf32>
    %58 = vector.broadcast %57 : vector<1x512xf32> to vector<27x512xf32>
    %59 = arith.mulf %58, %56 : vector<27x512xf32>
    %60 = arith.addf %46, %59 : vector<27x512xf32>
    %c0_23 = arith.constant 0 : index
    %c0_24 = arith.constant 0 : index
    %61 = vector.load %arg3[%c0_23, %c0_24] : memref<27x512xf32, #tpu.memory_space<vmem>>, vector<27x512xf32>
    %62 = arith.mulf %60, %61 : vector<27x512xf32>
    %c0_25 = arith.constant 0 : index
    %c0_26 = arith.constant 0 : index
    %c0_27 = arith.constant 0 : index
    %63 = vector.load %arg4[%c0_25, %c0_26, %c0_27] : memref<1x27x512xf32, #tpu.memory_space<vmem>>, vector<1x27x512xf32>
    %64 = vector.shape_cast %63 : vector<1x27x512xf32> to vector<27x512xf32>
    %65 = vector.shape_cast %62 : vector<27x512xf32> to vector<1x27x512xf32>
    tpu.vector_store %arg4[%c0_25, %c0_26, %c0_27], %65 {strides = array<i32>} : memref<1x27x512xf32, #tpu.memory_space<vmem>>, vector<1x27x512xf32>,
    return
  }
  func.func @transform_0(%arg0: i32) -> (i32, i32, i32) {
    %c0_i32 = arith.constant 0 : i32
    %c0_i32_0 = arith.constant 0 : i32
    %c0_i32_1 = arith.constant 0 : i32
    return %arg0, %c0_i32, %c0_i32_0 : i32, i32, i32
  }
  func.func @transform_1(%arg0: i32) -> (i32, i32, i32) {
    %c0_i32 = arith.constant 0 : i32
    %c0_i32_0 = arith.constant 0 : i32
    %c0_i32_1 = arith.constant 0 : i32
    return %arg0, %c0_i32, %c0_i32_0 : i32, i32, i32
  }
  func.func @transform_2(%arg0: i32) -> (i32, i32) {
    %c0_i32 = arith.constant 0 : i32
    %c0_i32_0 = arith.constant 0 : i32
    %c0_i32_1 = arith.constant 0 : i32
    return %c0_i32, %c0_i32_0 : i32, i32
  }
  func.func @transform_3(%arg0: i32) -> (i32, i32, i32) {
    %c0_i32 = arith.constant 0 : i32
    %c0_i32_0 = arith.constant 0 : i32
    %c0_i32_1 = arith.constant 0 : i32
    return %arg0, %c0_i32, %c0_i32_0 : i32, i32, i32
  }
}

</mosaic_0001>

<bundles_post_ra>
// kernel: tpu_custom_call.1
= control target key start
LH: loop header
LB: loop body
LE: loop exit
PB: predicated region body
PF: predicated region fallthrough
CT: control target
= control target key end

     0   :  { %8 = vsyncpa [#allocation3], 0  ;;  %s2903_s0 = inlined_call_operand.hbm [shape: f32[2,4,512], index: 0, kind: input, shape index: {}]   ;;  %s2904_s1 = inlined_call_operand.hbm [shape: f32[2,4,512], index: 1, kind: input, shape index: {}]   ;;  %s2905_s2 = inlined_call_operand.hbm [shape: f32[27,512], index: 2, kind: input, shape index: {}]   ;;  %s2906_s3 = inlined_call_operand.vmem [shape: f32[2,27,512], index: 3, kind: output, shape index: {}]  }
   0x1   :  { %10 = vsyncpa [#allocation3 + $0x1], 0 }
   0x2   :  { %11 = vsyncpa [#allocation5], 0 }
   0x3   :  { %13 = vsyncpa [#allocation5 + $0x1], 0  ;;  %s1588_s12 = smov 0   ;;  %s1590_s13 = smov 0  }
   0x4   :  { %s1592_s14 = smov 0   ;;  %s1594_s15 = smov 0  }
   0x5 LB: > { %s134_s18 = sshll.u32 %s2905_s2, 4  ;;  %s1610_s19 = sadd.s32 4294967295, %s1558_s15   ;;  %s1558_s15 = sphi %s1594_s15, %s2990_s15   ;;  %s1554_s14 = sphi %s1592_s14, %s2989_s14   ;;  %s1550_s13 = sphi %s1590_s13, %s2988_s13   ;;  %s1546_s12 = sphi %s1588_s12, %s2987_s12   ;;  %s135_s18 = int_to_ptr.hbm [resolvable:$true] %s134_s18 }
   0x6   : > { %p1344_p0 = scmp.ge.s32.totalorder %s1558_s15, 1  ;;  %p40_p1 = scmp.eq.s32.totalorder %s1610_s19, 0 }
   0x7   : > { %p123_p2 = scmp.lt.s32.totalorder %s1558_s15, 3  ;;  %s1560_s21 = smov [#allocation6]  }
   0x8   : > { %s136_s22 = sshll.u32 %s1560_s21, 4  ;;  %s1561_s23 = smov 512   ;;  %s137_s22 = int_to_ptr.vmem [resolvable:$true] %s136_s22 }
   0x9   : > { %p1615_p3 = pnand %p1344_p0, %p123_p2  ;;  %s1562_s24 = smov 32  }
   0xa   : > { %s1624_s25 = sadd.s32 1, %s1558_s15   ;;  %s26_s27 = sadd.s32 1, %s1554_s14 }
   0xb   : > { %p1372_p4 = pneg %p1615_p3  ;;  %s23_s26 = ssub.s32 %s1558_s15, %s1624_s25 }
   0xc   : > { %p24_p6 = scmp.eq.s32.totalorder %s23_s26, 0  ;;  %p33_p7 = scmp.ne.s32.totalorder %s1554_s14, %s1550_s13 }
   0xd   : > { %p1373_p5 = pnand %p1372_p4, %p40_p1  ;;  %p34_p8 = scmp.eq.s32.totalorder %s1558_s15, 0 }
   0xe   : > { %p39_p9 = scmp.ne.s32.totalorder %s1550_s13, %s1546_s12  ;;  %p1384_p12 = scmp.lt.s32.totalorder %s1558_s15, 2 }
   0xf   : > { %1375 = dma.hbm_to_vmem [thread:$0]  (!%p1373_p5), %s135_s18, 2048, %s137_s22, [#allocation5], %s1561_s23, %s1561_s23, %s1562_s24  }
  0x10   : > { %s1634_s28 = scalar_select %p24_p6, %s1554_s14, %s26_s27  }
  0x11   : > { %p35_p10 = por %p34_p8, %p33_p7  ;;  %p1638_p11 = por %p40_p1, %p39_p9 }
  0x12   : > { %s150_s30 = sand.u32 1, %s1554_s14   ;;  %s1361_s5 = sshll.u32 %s1558_s15, 4 }
  0x13   : > { %s1644_s4 = sshll.u32 %s150_s30, 4  ;;  %s159_s8 = scalar_lea.hbm %s2903_s0, %s1361_s5 }
  0x14   : > { %s154_s9 = scalar_lea.vmem [#allocation2], %s1644_s4  ;;  %s161_s11 = sshll.u32 %s159_s8, 4  ;;  %s162_s11 = int_to_ptr.hbm [resolvable:$true] %s161_s11 }
  0x15   : > { %s163_s10 = sshll.u32 %s154_s9, 4  ;;  %p1651_p13 = pnand %p1384_p12, %p35_p10  ;;  %s164_s10 = int_to_ptr.vmem [resolvable:$true] %s163_s10 }
  0x16   : > { %s179_s18 = scalar_lea.hbm %s2904_s1, %s1361_s5  ;;  %s170_s21 = sand.u32 1, %s1558_s15  }
  0x17   : > { %s151_s22 = scalar_lea.sflag [#allocation3], %s150_s30  ;;  %s1456_s23 = sshra.s32 %s162_s11, 4  ;;  %s1457_s23 = int_to_ptr.hbm [resolvable:$true] %s1456_s23 }
  0x18   : > { %s1458_s24 = scalar_lea.hbm %s1457_s23, 16  ;;  %p1460_p2 = pneg %p1651_p13 }
  0x19   : > { %p1459_p0 = scmp.ne.s32.totalorder %s1457_s23, %s1458_s24  ;;  %s1463_s6 = scalar_lea.hbm %s2903_s0, 32 }
  0x1a   : > { %p1464_p6 = scmp.lt.s32.totalorder %s1457_s23, %s2903_s0  ;;  %p1465_p7 = scmp.lt.s32.totalorder %s1463_s6, %s1458_s24 }
  0x1b   : > { %p1461_p4 = pnand %p1460_p2, %p1459_p0 }
  0x1c   : > { %p1466_p8 = por %p1465_p7, %p1464_p6 }
  0x1d   : > { %p1462_p5 = pneg %p1461_p4 }
  0x1f   : > { %p1467_p9 = pnand %p1466_p8, %p1462_p5 }
  0x21   : > { %1470 = shalt.err (!%p1467_p9)
}
  0x22   : > { %1379 = dma.hbm_to_vmem [thread:$0]  (!%p1651_p13), %s162_s11, 256, %s164_s10, %s151_s22  }
  0x23   : > { %s181_s15 = sshll.u32 %s179_s18, 4  ;;  %s174_s30 = scalar_lea.vmem [#allocation4], %s1644_s4  ;;  %s182_s15 = int_to_ptr.hbm [resolvable:$true] %s181_s15 }
  0x24   : > { %s183_s5 = sshll.u32 %s174_s30, 4  ;;  %s171_s9 = scalar_lea.sflag [#allocation5], %s170_s21  ;;  %s184_s5 = int_to_ptr.vmem [resolvable:$true] %s183_s5 }
  0x25   : > { %s1486_s16 = sshra.s32 %s182_s15, 4  ;;  %s1493_s26 = scalar_lea.hbm %s2904_s1, 32  ;;  %s1487_s16 = int_to_ptr.hbm [resolvable:$true] %s1486_s16 }
  0x26   : > { %s1488_s17 = scalar_lea.hbm %s1487_s16, 16  ;;  %p1494_p4 = scmp.lt.s32.totalorder %s1487_s16, %s2904_s1 }
  0x27   : > { %p1489_p10 = scmp.ne.s32.totalorder %s1487_s16, %s1488_s17  ;;  %p1495_p5 = scmp.lt.s32.totalorder %s1493_s26, %s1488_s17 }
  0x29   : > { %p1491_p12 = pnand %p1489_p10, %p1460_p2  ;;  %p1496_p6 = por %p1495_p5, %p1494_p4 }
  0x2b   : > { %p1492_p0 = pneg %p1491_p12 }
  0x2d   : > { %p1497_p7 = pnand %p1496_p6, %p1492_p0 }
  0x2f   : > { %1500 = shalt.err (!%p1497_p7)
}
  0x30   : > { %1382 = dma.hbm_to_vmem [thread:$0]  (!%p1651_p13), %s182_s15, 256, %s184_s5, %s171_s9  }
  0x31   : > { %192 = sbr.rel (%p1615_p3) target bundleno = 639 (0x27f), region = 32 }
  0x36   : > { %s194_s4 = sand.u32 1, %s1550_s13  }
  0x37   : > { %s1687_s11 = sshll.u32 %s194_s4, 4  ;;  %s195_s18 = scalar_lea.sflag [#allocation3], %s194_s4 }
  0x38   : > { %s198_s21 = scalar_lea.vmem [#allocation2], %s1687_s11 }
  0x39   : > { %1533 = dma.done.wait (%p1638_p11), %s195_s18, 256  }
  0x3a   : > { %1535 = vsyncadd (%p1638_p11), %s195_s18, 4294967040  ;;  %s204_s12 = sand.u32 1, %s1610_s19   ;;  %s208_s20 = scalar_lea.vmem [#allocation4], %s1687_s11 }
  0x3b   : > { %s205_s22 = scalar_lea.sflag [#allocation5], %s204_s12 }
  0x3c   : > { %1537 = dma.done.wait (%p1638_p11), %s205_s22, 256  }
  0x3d   : > { %1539 = vsyncadd (%p1638_p11), %s205_s22, 4294967040 }
  0x3e   : > { %1541 = dma.done.wait (%p40_p1), [#allocation5], 2048  }
  0x3f   : > { %1543 = vsyncadd (%p40_p1), [#allocation5], 4294965248  ;;  %v252_v0 = vld [vmem:[%s208_s20 + $0x8] sm:$0xff]  ;;  %v251_v1 = vld [vmem:[%s208_s20] sm:$0xff]  ;;  %s1563_s6 = smov 1   ;;  %s1564_s29 = smov 127   ;;  %v271_v19 = vlaneseq }
  0x40   : > { %v1704_v2 = vperm.slane %v252_v0, 0  ;;  %v1706_v3 = vperm.slane %v251_v1, 0  ;;  %v1714_v4 = vperm.slane %v252_v0, 4  ;;  %v1716_v5 = vperm.slane %v251_v1, 4  ;;  %s1565_s7 = smov 8   ;;  %s1566_s8 = smov 120  }
  0x41   : > { %v1724_v6 = vperm.slane %v252_v0, 1  ;;  %v1732_v7 = vperm.slane %v251_v1, 5  ;;  %v1734_v8 = vperm.slane %v251_v1, 1  ;;  %v1742_v9 = vperm.slane %v252_v0, 5  ;;  %s1567_s15 = smov 64   ;;  %p242_p1 = scmp.lt.s32.totalorder %s1610_s19, 1 }
  0x42   : > { %267 = vrot.lane.b32.xlu1 %v1704_v2, %s1563_s6  ;;  %263 = vrot.lane.b32.xlu0 %v1706_v3, %s1563_s6  ;;  %v1748_v10 = vperm.slane %v252_v0, 2  ;;  %v1758_v11 = vperm.slane %v251_v1, 6  ;;  %v1760_v12 = vperm.slane %v251_v1, 2  ;;  %v1762_v13 = vperm.slane %v251_v1, 3 }
  0x43   : > { %278 = vrot.lane.b32.xlu2 %v1706_v3, %s1564_s29  ;;  %v1770_v14 = vperm.slane %v252_v0, 7  ;;  %v1778_v15 = vperm.slane %v252_v0, 6  ;;  %v1784_v16 = vperm.slane %v252_v0, 3  ;;  %v1788_v17 = vperm.slane %v251_v1, 7  ;;  %s2992_s19 = smov (!%p242_p1, %s1610_s19), 1 }
  0x44   : > { %v1798_v20 = vand.u32 127, %v271_v19  ;;  %vm303_vm2 = vcmask 1040384   ;;  %vm308_vm3 = vcmask 1041408   ;;  %vm363_vm5 = vcmask 1042432   ;;  %s1363_s30 = sshll.u32 %s2992_s19, 7 }
  0x45   : > { %vm368_vm7 = vcmask 1045504   ;;  %s2599_s9 = scalar_lea.vmem %s2906_s3, %s1363_s30 }
  0x46   : > { %vm286_vm0 = vcmp.lt.s32.totalorder %v1798_v20, 127  ;;  %vm273_vm1 = vcmp.lt.s32.totalorder %v1798_v20, 1  ;;  %vm321_vm4 = vcmp.lt.s32.totalorder %v1798_v20, 8  ;;  %vm334_vm6 = vcmp.lt.s32.totalorder %v1798_v20, 120 }
  0x47   : > { %vm389_vm8 = vcmp.lt.s32.totalorder %v1798_v20, 64 }
  0x4a   : > { %269 = vrot.lane.b32.xlu1 %v1714_v4, %s1563_s6  ;;  %265 = vrot.lane.b32.xlu0 %v1716_v5, %s1563_s6 }
  0x4b   : > { %280 = vrot.lane.b32.xlu2 %v1716_v5, %s1564_s29 }
  0x52   : > { %284 = vrot.lane.b32.xlu1 %v1714_v4, %s1564_s29  ;;  %282 = vrot.lane.b32.xlu0 %v1704_v2, %s1564_s29 }
  0x53   : > { %500 = vrot.lane.b32.xlu2 %v1724_v6, %s1563_s6 }
  0x5a   : > { %498 = vrot.lane.b32.xlu1 %v1732_v7, %s1563_s6  ;;  %496 = vrot.lane.b32.xlu0 %v1734_v8, %s1563_s6 }
  0x5b   : > { %510 = vrot.lane.b32.xlu2 %v1732_v7, %s1564_s29 }
  0x62   : > { %508 = vrot.lane.b32.xlu1 %v1734_v8, %s1564_s29  ;;  %502 = vrot.lane.b32.xlu0 %v1742_v9, %s1563_s6 }
  0x63   : > { %736 = vrot.lane.b32.xlu2 %v1748_v10, %s1563_s6 }
  0x6a   : > { %514 = vrot.lane.b32.xlu1 %v1742_v9, %s1564_s29  ;;  %512 = vrot.lane.b32.xlu0 %v1724_v6, %s1564_s29 }
  0x6b   : > { %748 = vrot.lane.b32.xlu2 %v1748_v10, %s1564_s29 }
  0x72   : > { %734 = vrot.lane.b32.xlu1 %v1758_v11, %s1563_s6  ;;  %732 = vrot.lane.b32.xlu0 %v1760_v12, %s1563_s6 }
  0x73   : > { %980 = vrot.lane.b32.xlu2 %v1762_v13, %s1564_s29 }
  0x7a   : > { %746 = vrot.lane.b32.xlu1 %v1758_v11, %s1564_s29  ;;  %744 = vrot.lane.b32.xlu0 %v1760_v12, %s1564_s29 }
  0x7b   : > { %986 = vrot.lane.b32.xlu2 %v1770_v14, %s1564_s29 }
  0x82   : > { %738 = vrot.lane.b32.xlu1 %v1778_v15, %s1563_s6  ;;  %750 = vrot.lane.b32.xlu0 %v1778_v15, %s1564_s29 }
  0x83   : > { %972 = vrot.lane.b32.xlu2 %v1784_v16, %s1563_s6 }
  0x8a   : > { %984 = vrot.lane.b32.xlu1 %v1784_v16, %s1564_s29  ;;  %982 = vrot.lane.b32.xlu0 %v1788_v17, %s1564_s29 }
  0x92   : > { %970 = vrot.lane.b32.xlu1 %v1788_v17, %s1563_s6  ;;  %968 = vrot.lane.b32.xlu0 %v1762_v13, %s1563_s6 }
  0x9d   : > { %v279_v18 = vpop.permute.xlu2 %278 }
  0xa5   : > { %v281_v23 = vpop.permute.xlu2 %280 }
  0xa6   : > { %v289_v24 = vsel %vm286_vm0, %v279_v18, %v281_v23 }
  0xa7   : > { %v295_v25 = vrot.slane %v289_v24, 6 }
  0xad   : > { %v501_v31 = vpop.permute.xlu2 %500 }
  0xb4   : > { %v268_v21 = vpop.permute.xlu1 %267  ;;  %v264_v22 = vpop.permute.xlu0 %263 }
  0xb5   : > { %v511_v49 = vpop.permute.xlu2 %510 }
  0xbc   : > { %v270_v26 = vpop.permute.xlu1 %269  ;;  %v266_v27 = vpop.permute.xlu0 %265 }
  0xbd   : > { %v277_v28 = vsel %vm273_vm1, %v270_v26, %v264_v22  ;;  %v274_v32 = vsel %vm273_vm1, %v268_v21, %v270_v26  ;;  %v275_v33 = vsel %vm273_vm1, %v266_v27, %v268_v21  ;;  %v276_v34 = vsel %vm273_vm1, %v264_v22, %v266_v27  ;;  %v737_v52 = vpop.permute.xlu2 %736 }
  0xbe   : > { %v304_v29 = vsel %vm303_vm2, %v277_v28, %v1706_v3  ;;  %v307_v40 = vsel %vm303_vm2, %v274_v32, %v1714_v4  ;;  %v305_v44 = vsel %vm303_vm2, %v276_v34, %v1716_v5  ;;  %v306_v45 = vsel %vm303_vm2, %v275_v33, %v1704_v2 }
  0xbf   : > { %v1809_v30 = vsel %vm308_vm3, %v304_v29, %v295_v25 }
  0xc0   : > { %313 = vrot.lane.b32.xlu2 %v1809_v30, %s1565_s7 }
  0xc4   : > { %v285_v35 = vpop.permute.xlu1 %284  ;;  %v283_v36 = vpop.permute.xlu0 %282 }
  0xc5   : > { %v290_v37 = vsel %vm286_vm0, %v285_v35, %v279_v18  ;;  %v287_v38 = vsel %vm286_vm0, %v283_v36, %v285_v35  ;;  %v288_v39 = vsel %vm286_vm0, %v281_v23, %v283_v36  ;;  %v749_v60 = vpop.permute.xlu2 %748 }
  0xc6   : > { %v298_v41 = vrot.slane %v290_v37, 6  ;;  %v296_v42 = vrot.slane %v288_v39, 6  ;;  %v297_v43 = vrot.slane %v287_v38, 6 }
  0xc8   : > { %v1832_v46 = vsel %vm308_vm3, %v307_v40, %v298_v41  ;;  %v1835_v47 = vsel %vm308_vm3, %v305_v44, %v296_v42  ;;  %v1838_v48 = vsel %vm308_vm3, %v306_v45, %v297_v43 }
  0xc9   : > { %319 = vrot.lane.b32.xlu2 %v1832_v46, %s1565_s7  ;;  %315 = vrot.lane.b32.xlu0 %v1835_v47, %s1565_s7 }
  0xca   : > { %317 = vrot.lane.b32.xlu1 %v1838_v48, %s1565_s7 }
  0xcc   : > { %v499_v50 = vpop.permute.xlu1 %498  ;;  %v497_v51 = vpop.permute.xlu0 %496 }
  0xcd   : > { %v505_v61 = vsel %vm273_vm1, %v499_v50, %v501_v31  ;;  %v506_v62 = vsel %vm273_vm1, %v497_v51, %v499_v50 }
  0xce   : > { %v533_v21 = vsel %vm303_vm2, %v506_v62, %v1732_v7  ;;  %v534_v22 = vsel %vm303_vm2, %v505_v61, %v1724_v6 }
  0xd1   : > { %326 = vrot.lane.b32.xlu0 %v1809_v30, %s1566_s8  ;;  %330 = vrot.lane.b32.xlu2 %v1838_v48, %s1566_s8 }
  0xd2   : > { %328 = vrot.lane.b32.xlu1 %v1835_v47, %s1566_s8 }
  0xd4   : > { %v509_v53 = vpop.permute.xlu1 %508  ;;  %v503_v54 = vpop.permute.xlu0 %502 }
  0xd5   : > { %v518_v55 = vsel %vm286_vm0, %v509_v53, %v511_v49  ;;  %v507_v56 = vsel %vm273_vm1, %v503_v54, %v497_v51  ;;  %v504_v63 = vsel %vm273_vm1, %v501_v31, %v503_v54 }
  0xd6   : > { %v524_v57 = vrot.slane %v518_v55, 6  ;;  %v532_v58 = vsel %vm303_vm2, %v507_v56, %v1734_v8  ;;  %v535_v19 = vsel %vm303_vm2, %v504_v63, %v1742_v9  ;;  %v981_v9 = vpop.permute.xlu2 %980 }
  0xd8   : > { %v1859_v59 = vsel %vm308_vm3, %v532_v58, %v524_v57 }
  0xd9   : > { %332 = vrot.lane.b32.xlu0 %v1832_v46, %s1566_s8  ;;  %540 = vrot.lane.b32.xlu2 %v1859_v59, %s1565_s7 }
  0xdc   : > { %v515_v0 = vpop.permute.xlu1 %514  ;;  %v513_v1 = vpop.permute.xlu0 %512 }
  0xdd   : > { %v519_v2 = vsel %vm286_vm0, %v515_v0, %v509_v53  ;;  %v516_v3 = vsel %vm286_vm0, %v513_v1, %v515_v0  ;;  %v517_v4 = vsel %vm286_vm0, %v511_v49, %v513_v1 }
  0xde   : > { %v527_v5 = vrot.slane %v519_v2, 6  ;;  %v525_v8 = vrot.slane %v517_v4, 6  ;;  %v526_v18 = vrot.slane %v516_v3, 6  ;;  %v987_v26 = vpop.permute.xlu2 %986 }
  0xdf   : > { %v1906_v27 = vsel %vm286_vm0, %v987_v26, %v981_v9 }
  0xe0   : > { %v1884_v23 = vsel %vm308_vm3, %v535_v19, %v527_v5  ;;  %v1887_v24 = vsel %vm308_vm3, %v533_v21, %v525_v8  ;;  %v1890_v25 = vsel %vm308_vm3, %v534_v22, %v526_v18  ;;  %v344_v22 = vrot.slane %v1835_v47, 5 }
  0xe1   : > { %546 = vrot.lane.b32.xlu2 %v1884_v23, %s1565_s7  ;;  %542 = vrot.lane.b32.xlu0 %v1887_v24, %s1565_s7 }
  0xe2   : > { %544 = vrot.lane.b32.xlu1 %v1890_v25, %s1565_s7 }
  0xe4   : > { %v735_v6 = vpop.permute.xlu1 %734  ;;  %v733_v7 = vpop.permute.xlu0 %732 }
  0xe5   : > { %v741_v39 = vsel %vm273_vm1, %v735_v6, %v737_v52 }
  0xe6   : > { %v770_v49 = vsel %vm303_vm2, %v741_v39, %v1748_v10  ;;  %v1964_v57 = vpop.permute.xlu2 %972 }
  0xe9   : > { %552 = vrot.lane.b32.xlu0 %v1859_v59, %s1566_s8  ;;  %556 = vrot.lane.b32.xlu2 %v1890_v25, %s1566_s8 }
  0xea   : > { %554 = vrot.lane.b32.xlu1 %v1887_v24, %s1566_s8 }
  0xec   : > { %v747_v28 = vpop.permute.xlu1 %746  ;;  %v745_v29 = vpop.permute.xlu0 %744 }
  0xed   : > { %v754_v31 = vsel %vm286_vm0, %v745_v29, %v747_v28  ;;  %v753_v42 = vsel %vm286_vm0, %v747_v28, %v749_v60  ;;  %v345_v28 = vrot.slane %v1838_v48, 5 }
  0xee   : > { %v760_v32 = vrot.slane %v754_v31, 6  ;;  %v761_v45 = vrot.slane %v753_v42, 6 }
  0xf1   : > { %558 = vrot.lane.b32.xlu0 %v1884_v23, %s1566_s8 }
  0xf4   : > { %v739_v33 = vpop.permute.xlu1 %738  ;;  %v751_v34 = vpop.permute.xlu0 %750 }
  0xf5   : > { %v743_v35 = vsel %vm273_vm1, %v739_v33, %v733_v7  ;;  %v752_v37 = vsel %vm286_vm0, %v749_v60, %v751_v34  ;;  %v755_v38 = vsel %vm286_vm0, %v751_v34, %v745_v29  ;;  %v740_v40 = vsel %vm273_vm1, %v737_v52, %v739_v33 }
  0xf6   : > { %v768_v36 = vsel %vm303_vm2, %v743_v35, %v1760_v12  ;;  %v742_v12 = vsel %vm273_vm1, %v733_v7, %v735_v6  ;;  %v762_v43 = vrot.slane %v752_v37, 6  ;;  %v763_v44 = vrot.slane %v755_v38, 6 }
  0xf7   : > { %v1925_v41 = vsel %vm308_vm3, %v768_v36, %v760_v32  ;;  %v771_v50 = vsel %vm303_vm2, %v740_v40, %v1778_v15  ;;  %v769_v51 = vsel %vm303_vm2, %v742_v12, %v1758_v11 }
  0xf8   : > { %776 = vrot.lane.b32.xlu1 %v1925_v41, %s1565_s7  ;;  %788 = vrot.lane.b32.xlu2 %v1925_v41, %s1566_s8  ;;  %v1944_v54 = vsel %vm308_vm3, %v770_v49, %v762_v43  ;;  %v1947_v55 = vsel %vm308_vm3, %v771_v50, %v763_v44  ;;  %v1954_v10 = vsel %vm308_vm3, %v769_v51, %v761_v45  ;;  %v569_v50 = vrot.slane %v1887_v24, 5 }
  0xf9   : > { %974 = vrot.lane.b32.xlu0 %v1770_v14, %s1563_s6 }
  0xfc   : > { %v985_v52 = vpop.permute.xlu1 %984  ;;  %v983_v53 = vpop.permute.xlu0 %982 }
  0xfd   : > { %v1951_v56 = vsel %vm286_vm0, %v981_v9, %v983_v53  ;;  %v988_v58 = vsel %vm286_vm0, %v985_v52, %v987_v26  ;;  %v989_v60 = vsel %vm286_vm0, %v983_v53, %v985_v52  ;;  %v568_v9 = vrot.slane %v1859_v59, 5 }
  0xfe   : > { %v998_v63 = vrot.slane %v988_v58, 6  ;;  %v997_v0 = vrot.slane %v989_v60, 6  ;;  %v346_v26 = vrot.slane %v1832_v46, 5  ;;  %v571_v52 = vrot.slane %v1884_v23, 5 }
  0xff   : > { %v570_v53 = vrot.slane %v1890_v25, 5 }
 0x100   : > { %792 = vrot.lane.b32.xlu1 %v1944_v54, %s1566_s8  ;;  %794 = vrot.lane.b32.xlu2 %v1947_v55, %s1566_s8 }
 0x101   : > { %790 = vrot.lane.b32.xlu0 %v1954_v10, %s1566_s8 }
 0x104   : > { %v971_v11 = vpop.permute.xlu1 %970  ;;  %v1962_v15 = vpop.permute.xlu0 %968 }
 0x105   : > { %v977_v61 = vsel %vm273_vm1, %v971_v11, %v1964_v57  ;;  %v978_v62 = vsel %vm273_vm1, %v1962_v15, %v971_v11 }
 0x106   : > { %v1005_v1 = vsel %vm303_vm2, %v978_v62, %v1788_v17  ;;  %v1006_v2 = vsel %vm303_vm2, %v977_v61, %v1784_v16  ;;  %v343_v16 = vrot.slane %v1809_v30, 5 }
 0x107   : > { %v1987_v3 = vsel %vm308_vm3, %v1005_v1, %v997_v0  ;;  %v1990_v4 = vsel %vm308_vm3, %v1006_v2, %v998_v63 }
 0x108   : > { %780 = vrot.lane.b32.xlu1 %v1944_v54, %s1565_s7  ;;  %782 = vrot.lane.b32.xlu2 %v1947_v55, %s1565_s7 }
 0x109   : > { %778 = vrot.lane.b32.xlu0 %v1954_v10, %s1565_s7 }
 0x110   : > { %1026 = vrot.lane.b32.xlu1 %v1987_v3, %s1566_s8  ;;  %1028 = vrot.lane.b32.xlu2 %v1990_v4, %s1566_s8 }
 0x118   : > { %1014 = vrot.lane.b32.xlu2 %v1987_v3, %s1565_s7 }
 0x11a   : > { %v314_v5 = vpop.permute.xlu2 %313 }
 0x123   : > { %v320_v17 = vpop.permute.xlu2 %319 }
 0x124   : > { %v325_v8 = vsel %vm321_vm4, %v320_v17, %v314_v5 }
 0x125   : > { %v364_v18 = vsel %vm363_vm5, %v325_v8, %v343_v16 }
 0x12b   : > { %v2003_v19 = vpop.permute.xlu2 %330 }
 0x133   : > { %v541_v21 = vpop.permute.xlu2 %540 }
 0x13b   : > { %v547_v6 = vpop.permute.xlu2 %546  ;;  %v316_v7 = vpop.permute.xlu0 %315 }
 0x13c   : > { %v318_v30 = vpop.permute.xlu1 %317  ;;  %v551_v29 = vsel %vm321_vm4, %v547_v6, %v541_v21  ;;  %v324_v31 = vsel %vm321_vm4, %v314_v5, %v316_v7 }
 0x13d   : > { %v322_v32 = vsel %vm321_vm4, %v318_v30, %v320_v17  ;;  %v323_v47 = vsel %vm321_vm4, %v316_v7, %v318_v30  ;;  %v2018_v59 = vsel %vm363_vm5, %v324_v31, %v344_v22  ;;  %v588_v46 = vsel %vm363_vm5, %v551_v29, %v568_v9 }
 0x13e   : > { %v367_v48 = vsel %vm363_vm5, %v322_v32, %v346_v26  ;;  %v366_v33 = vsel %vm363_vm5, %v323_v47, %v345_v28  ;;  %v804_v26 = vrot.slane %v1925_v41, 5  ;;  %v996_v31 = vrot.slane %v1951_v56, 6 }
 0x143   : > { %v327_v34 = vpop.permute.xlu0 %326  ;;  %v2037_v40 = vpop.permute.xlu2 %556 }
 0x144   : > { %v2024_v35 = vpop.permute.xlu1 %328 }
 0x145   : > { %v337_v36 = vsel %vm334_vm6, %v327_v34, %v2024_v35 }
 0x146   : > { %v2029_v37 = vrot.slane %v337_v36, 2 }
 0x148   : > { %375 = vrot.lane.b32.xlu2 %v2029_v37, %s1567_s15  ;;  %v2035_v38 = vsel %vm368_vm7, %v364_v18, %v2029_v37 }
 0x14b   : > { %v333_v39 = vpop.permute.xlu0 %332 }
 0x14c   : > { %v335_v42 = vsel %vm334_vm6, %v2003_v19, %v333_v39  ;;  %v338_v12 = vsel %vm334_vm6, %v333_v39, %v327_v34 }
 0x14d   : > { %v2044_v43 = vrot.slane %v335_v42, 2  ;;  %v2046_v44 = vrot.slane %v338_v12, 2 }
 0x14f   : > { %v2050_v45 = vsel %vm368_vm7, %v367_v48, %v2046_v44  ;;  %v2054_v49 = vsel %vm368_vm7, %v366_v33, %v2044_v43 }
 0x150   : > { %387 = vrot.lane.b32.xlu2 %v2046_v44, %s1567_s15 }
 0x152   : > { %v2063_v60 = vpop.permute.xlu2 %788 }
 0x153   : > { %v543_v51 = vpop.permute.xlu0 %542 }
 0x154   : > { %v545_v11 = vpop.permute.xlu1 %544  ;;  %v550_v58 = vsel %vm321_vm4, %v541_v21, %v543_v51 }
 0x155   : > { %v548_v61 = vsel %vm321_vm4, %v545_v11, %v547_v6  ;;  %v549_v62 = vsel %vm321_vm4, %v543_v51, %v545_v11  ;;  %v2070_v63 = vsel %vm363_vm5, %v550_v58, %v569_v50  ;;  %v807_v51 = vrot.slane %v1947_v55, 5 }
 0x156   : > { %v591_v24 = vsel %vm363_vm5, %v548_v61, %v571_v52  ;;  %v590_v23 = vsel %vm363_vm5, %v549_v62, %v570_v53  ;;  %v806_v53 = vrot.slane %v1944_v54, 5  ;;  %v805_v11 = vrot.slane %v1954_v10, 5 }
 0x15a   : > { %v2081_v5 = vpop.permute.xlu2 %794 }
 0x15b   : > { %v553_v25 = vpop.permute.xlu0 %552 }
 0x15c   : > { %v2074_v0 = vpop.permute.xlu1 %554 }
 0x15d   : > { %v562_v1 = vsel %vm334_vm6, %v553_v25, %v2074_v0 }
 0x15e   : > { %v2079_v2 = vrot.slane %v562_v1, 2 }
 0x160   : > { %598 = vrot.lane.b32.xlu2 %v2079_v2, %s1567_s15  ;;  %v2087_v16 = vsel %vm368_vm7, %v588_v46, %v2079_v2 }
 0x162   : > { %v783_v7 = vpop.permute.xlu2 %782 }
 0x163   : > { %v559_v17 = vpop.permute.xlu0 %558 }
 0x164   : > { %v560_v8 = vsel %vm334_vm6, %v2037_v40, %v559_v17  ;;  %v563_v18 = vsel %vm334_vm6, %v559_v17, %v553_v25 }
 0x165   : > { %v2094_v21 = vrot.slane %v560_v8, 2  ;;  %v2096_v22 = vrot.slane %v563_v18, 2 }
 0x167   : > { %v2100_v9 = vsel %vm368_vm7, %v591_v24, %v2096_v22  ;;  %v2104_v6 = vsel %vm368_vm7, %v590_v23, %v2094_v21 }
 0x168   : > { %610 = vrot.lane.b32.xlu2 %v2096_v22, %s1567_s15 }
 0x16a   : > { %v777_v28 = vpop.permute.xlu1 %776 }
 0x16b   : > { %v787_v30 = vsel %vm321_vm4, %v783_v7, %v777_v28  ;;  %v975_v29 = vpop.permute.xlu0 %974 }
 0x16c   : > { %v979_v32 = vsel %vm273_vm1, %v975_v29, %v1962_v15  ;;  %v824_v47 = vsel %vm363_vm5, %v787_v30, %v804_v26  ;;  %v976_v41 = vsel %vm273_vm1, %v1964_v57, %v975_v29  ;;  %v561_v26 = vsel %vm334_vm6, %v2074_v0, %v2037_v40  ;;  %v1029_v29 = vpop.permute.xlu2 %1028 }
 0x16d   : > { %v1004_v46 = vsel %vm303_vm2, %v979_v32, %v1762_v13  ;;  %v1007_v33 = vsel %vm303_vm2, %v976_v41, %v1770_v14  ;;  %v999_v13 = vrot.slane %v1906_v27, 6  ;;  %v336_v27 = vsel %vm334_vm6, %v2024_v35, %v2003_v19 }
 0x16e   : > { %v2119_v48 = vsel %vm308_vm3, %v1004_v46, %v996_v31  ;;  %v2162_v62 = vrot.slane %v336_v27, 2  ;;  %v799_v40 = vsel %vm334_vm6, %v2081_v5, %v2063_v60 }
 0x16f   : > { %1012 = vrot.lane.b32.xlu1 %v2119_v48, %s1565_s7  ;;  %1024 = vrot.lane.b32.xlu0 %v2119_v48, %s1566_s8  ;;  %v2142_v12 = vsel %vm308_vm3, %v1007_v33, %v999_v13  ;;  %v2220_v0 = vrot.slane %v799_v40, 2 }
 0x172   : > { %v793_v56 = vpop.permute.xlu1 %792 }
 0x173   : > { %v791_v15 = vpop.permute.xlu0 %790  ;;  %v796_v57 = vsel %vm334_vm6, %v793_v56, %v2081_v5 }
 0x174   : > { %v797_v34 = vsel %vm334_vm6, %v791_v15, %v793_v56  ;;  %v798_v36 = vsel %vm334_vm6, %v2063_v60, %v791_v15  ;;  %v818_v50 = vrot.slane %v796_v57, 2 }
 0x175   : > { %v2136_v39 = vrot.slane %v798_v36, 2  ;;  %v817_v42 = vrot.slane %v797_v34, 2  ;;  %v1040_v36 = vrot.slane %v2119_v48, 5 }
 0x176   : > { %v868_v55 = vrot.slane %v818_v50, 7 }
 0x177   : > { %1018 = vrot.lane.b32.xlu1 %v2142_v12, %s1565_s7  ;;  %1030 = vrot.lane.b32.xlu0 %v2142_v12, %s1566_s8  ;;  %v2150_v14 = vsel %vm368_vm7, %v824_v47, %v2136_v39  ;;  %v866_v23 = vrot.slane %v817_v42, 7  ;;  %v2229_v47 = vsel %vm368_vm7, %v2018_v59, %v2162_v62  ;;  %v1015_v59 = vpop.permute.xlu2 %1014 }
 0x178   : > { %838 = vrot.lane.b32.xlu2 %v817_v42, %s1567_s15 }
 0x17a   : > { %v781_v52 = vpop.permute.xlu1 %780 }
 0x17b   : > { %v784_v58 = vsel %vm321_vm4, %v781_v52, %v783_v7  ;;  %v779_v61 = vpop.permute.xlu0 %778 }
 0x17c   : > { %v785_v24 = vsel %vm321_vm4, %v779_v61, %v781_v52  ;;  %v786_v19 = vsel %vm321_vm4, %v777_v28, %v779_v61  ;;  %v2169_v35 = vsel %vm363_vm5, %v784_v58, %v807_v51  ;;  %v2199_v28 = vrot.slane %v561_v26, 2 }
 0x17d   : > { %v826_v54 = vsel %vm363_vm5, %v785_v24, %v806_v53  ;;  %v825_v10 = vsel %vm363_vm5, %v786_v19, %v805_v11  ;;  %v1042_v19 = vrot.slane %v1990_v4, 5 }
 0x17e   : > { %v2174_v25 = vsel %vm368_vm7, %v826_v54, %v818_v50  ;;  %v2177_v1 = vsel %vm368_vm7, %v825_v10, %v817_v42  ;;  %v2238_v60 = vsel %vm368_vm7, %v2070_v63, %v2199_v28  ;;  %v1041_v63 = vrot.slane %v1987_v3, 5 }
 0x17f   : > { %379 = vrot.lane.b32.xlu1 %v2162_v62, %s1567_s15  ;;  %1016 = vrot.lane.b32.xlu0 %v1990_v4, %s1565_s7  ;;  %v862_v17 = vrot.slane %v2174_v25, 7  ;;  %v2912_v8 = vrot.slane %v2177_v1, 7 }
 0x181   : > { %v2188_v18 = vsel %vm303_vm2, %v862_v17, %v868_v55  ;;  %v2193_v7 = vsel %vm303_vm2, %v2912_v8, %v866_v23  ;;  %v1043_v55 = vrot.slane %v2142_v12, 5 }
 0x182   : > { %2936 = vst [vmem:[#allocation10_spill] sm:$0xff] %v2188_v18  ;;  %v1027_v30 = vpop.permute.xlu1 %1026 }
 0x183   : > { %v1033_v31 = vsel %vm334_vm6, %v1027_v30, %v1029_v29 }
 0x184   : > { %v2210_v32 = vrot.slane %v1033_v31, 2 }
 0x187   : > { %602 = vrot.lane.b32.xlu1 %v2199_v28, %s1567_s15  ;;  %383 = vrot.lane.b32.xlu0 %v2044_v43, %s1567_s15 }
 0x18f   : > { %842 = vrot.lane.b32.xlu1 %v818_v50, %s1567_s15  ;;  %606 = vrot.lane.b32.xlu0 %v2094_v21, %s1567_s15 }
 0x197   : > { %1074 = vrot.lane.b32.xlu1 %v2210_v32, %s1567_s15  ;;  %834 = vrot.lane.b32.xlu0 %v2136_v39, %s1567_s15 }
 0x19f   : > { %373 = vrot.lane.b32.xlu1 %v2035_v38, %s1567_s15  ;;  %846 = vrot.lane.b32.xlu0 %v2220_v0, %s1567_s15 }
 0x1a2   : > { %v2250_v5 = vpop.permute.xlu2 %375 }
 0x1a7   : > { %385 = vrot.lane.b32.xlu1 %v2050_v45, %s1567_s15  ;;  %377 = vrot.lane.b32.xlu0 %v2229_v47, %s1567_s15 }
 0x1aa   : > { %v2265_v3 = vpop.permute.xlu2 %387 }
 0x1af   : > { %596 = vrot.lane.b32.xlu1 %v2087_v16, %s1567_s15  ;;  %600 = vrot.lane.b32.xlu0 %v2238_v60, %s1567_s15 }
 0x1b7   : > { %608 = vrot.lane.b32.xlu1 %v2100_v9, %s1567_s15  ;;  %840 = vrot.lane.b32.xlu0 %v2174_v25, %s1567_s15 }
 0x1ba   : > { %v2281_v58 = vpop.permute.xlu2 %598 }
 0x1bf   : > { %836 = vrot.lane.b32.xlu1 %v2177_v1, %s1567_s15 }
 0x1e1   : > { %v1013_v46 = vpop.permute.xlu1 %1012  ;;  %v1025_v41 = vpop.permute.xlu0 %1024 }
 0x1e2   : > { %v1022_v56 = vsel %vm321_vm4, %v1013_v46, %v1015_v59  ;;  %v1034_v15 = vsel %vm334_vm6, %v1025_v41, %v1027_v30 }
 0x1e3   : > { %v1052_v33 = vrot.slane %v1034_v15, 2  ;;  %v1061_v13 = vsel %vm363_vm5, %v1022_v56, %v1041_v63 }
 0x1e4   : > { %v2260_v34 = vsel %vm368_vm7, %v1061_v13, %v2210_v32 }
 0x1e5   : > { %1072 = vrot.lane.b32.xlu0 %v2260_v34, %s1567_s15  ;;  %1070 = vrot.lane.b32.xlu2 %v1052_v33, %s1567_s15  ;;  %v1100_v11 = vrot.slane %v1052_v33, 7 }
 0x1e9   : > { %v1019_v57 = vpop.permute.xlu1 %1018  ;;  %v1031_v42 = vpop.permute.xlu0 %1030 }
 0x1ea   : > { %v1023_v27 = vsel %vm321_vm4, %v1019_v57, %v1013_v46  ;;  %v1032_v50 = vsel %vm334_vm6, %v1029_v29, %v1031_v42  ;;  %v1035_v61 = vsel %vm334_vm6, %v1031_v42, %v1025_v41  ;;  %v248_v41 = vld [vmem:[%s198_s21 + $0x8] sm:$0xff] }
 0x1eb   : > { %v1054_v51 = vrot.slane %v1032_v50, 2  ;;  %v1060_v52 = vsel %vm363_vm5, %v1023_v27, %v1040_v36  ;;  %v2293_v23 = vrot.slane %v1035_v61, 2 }
 0x1ec   : > { %v2274_v53 = vsel %vm368_vm7, %v1060_v52, %v1052_v33  ;;  %v2329_v33 = vpop.permute.xlu2 %610 }
 0x1ed   : > { %2937 = vst [vmem:[#allocation11_spill] sm:$0xff] %v2274_v53  ;;  %381 = vrot.lane.b32.xlu2 %v2054_v49, %s1567_s15  ;;  %1068 = vrot.lane.b32.xlu1 %v2274_v53, %s1567_s15  ;;  %v2908_v48 = vrot.slane %v2274_v53, 7  ;;  %v1104_v40 = vrot.slane %v1054_v51, 7  ;;  %v1106_v63 = vrot.slane %v2293_v23, 7 }
 0x1ee   : > { %1078 = vrot.lane.b32.xlu0 %v1054_v51, %s1567_s15 }
 0x1ef   : > { %v2289_v24 = vsel %vm303_vm2, %v2908_v48, %v1100_v11  ;;  %v2911_v11 = vrot.slane %v2054_v49, 7 }
 0x1f0   : > { %2938 = vst [vmem:[#allocation12_spill] sm:$0xff] %v2289_v24 }
 0x1f1   : > { %v2295_v54 = vpop.permute.xlu1 %379  ;;  %v1017_v10 = vpop.permute.xlu0 %1016 }
 0x1f2   : > { %v1020_v26 = vsel %vm321_vm4, %v1017_v10, %v1019_v57  ;;  %v1021_v30 = vsel %vm321_vm4, %v1015_v59, %v1017_v10  ;;  %v2333_v57 = vmul.f32 0.25, %v248_v41 }
 0x1f3   : > { %v1063_v29 = vsel %vm363_vm5, %v1020_v26, %v1043_v55  ;;  %v1062_v31 = vsel %vm363_vm5, %v1021_v30, %v1042_v19  ;;  %v2910_v26 = vrot.slane %v2104_v6, 7 }
 0x1f4   : > { %v2305_v4 = vsel %vm368_vm7, %v1063_v29, %v2293_v23  ;;  %v2308_v12 = vsel %vm368_vm7, %v1062_v31, %v1054_v51  ;;  %2943 = vst [vmem:[#allocation17_spill] sm:$0xff] %v2333_v57  ;;  %v462_v42 = vperm.slane %v2333_v57, 0  ;;  %v682_v27 = vperm.slane %v2333_v57, 1  ;;  %v2346_v52 = vpop.permute.xlu2 %838 }
 0x1f5   : > { %2939 = vst [vmem:[#allocation13_spill] sm:$0xff] %v2305_v4  ;;  %604 = vrot.lane.b32.xlu2 %v2104_v6, %s1567_s15  ;;  %1080 = vrot.lane.b32.xlu1 %v2305_v4, %s1567_s15  ;;  %v2907_v59 = vrot.slane %v2305_v4, 7  ;;  %v2909_v46 = vrot.slane %v2308_v12, 7  ;;  %v918_v51 = vperm.slane %v2333_v57, 2 }
 0x1f6   : > { %2940 = vst [vmem:[#allocation14_spill] sm:$0xff] %v2308_v12  ;;  %v2349_v61 = vperm.slane %v462_v42, 0  ;;  %v2351_v10 = vperm.slane %v682_v27, 1  ;;  %v2381_v42 = vsel %vm368_vm7, %v2169_v35, %v2220_v0  ;;  %v463_v35 = vperm.slane %v2333_v57, 4 }
 0x1f7   : > { %v2322_v56 = vsel %vm303_vm2, %v2907_v59, %v1106_v63  ;;  %v2327_v15 = vsel %vm303_vm2, %v2909_v46, %v1104_v40  ;;  %v2368_v40 = vperm.slane %v918_v51, 2  ;;  %v683_v59 = vperm.slane %v2333_v57, 5 }
 0x1f8   : > { %2941 = vst [vmem:[#allocation15_spill] sm:$0xff] %v2322_v56 }
 0x1f9   : > { %2942 = vst [vmem:[#allocation16_spill] sm:$0xff] %v2327_v15  ;;  %v2331_v13 = vpop.permute.xlu1 %602  ;;  %v384_v36 = vpop.permute.xlu0 %383 }
 0x1fa   : > { %v2343_v50 = vsel %vm389_vm8, %v2295_v54, %v384_v36  ;;  %2944 = vst [vmem:[#allocation18_spill] sm:$0xff] %v2351_v10 }
 0x1fb   : > { %v452_v30 = vsel %vm303_vm2, %v2343_v50, %v2911_v11  ;;  %2945 = vst [vmem:[#allocation19_spill] sm:$0xff] %v2368_v40  ;;  %v2915_v11 = vrot.slane %v2381_v42, 7 }
 0x1fc   : > { %v478_v27 = vmul.f32 %v2349_v61, %v452_v30 }
 0x1fd   : > { %832 = vrot.lane.b32.xlu2 %v2150_v14, %s1567_s15 }
 0x201   : > { %v843_v19 = vpop.permute.xlu1 %842  ;;  %v607_v55 = vpop.permute.xlu0 %606 }
 0x202   : > { %v2361_v29 = vsel %vm389_vm8, %v2346_v52, %v843_v19  ;;  %v2366_v31 = vsel %vm389_vm8, %v2331_v13, %v607_v55  ;;  %v2399_v30 = vsel %vm389_vm8, %v607_v55, %v2329_v33  ;;  %v2415_v55 = vperm.slane %v463_v35, 0 }
 0x203   : > { %v910_v63 = vsel %vm303_vm2, %v2361_v29, %v862_v17  ;;  %v674_v41 = vsel %vm303_vm2, %v2366_v31, %v2910_v26 }
 0x204   : > { %v698_v51 = vmul.f32 %v2351_v10, %v674_v41  ;;  %v934_v25 = vmul.f32 %v2368_v40, %v910_v63  ;;  %v627_v41 = vrot.slane %v2100_v9, 7  ;;  %v2405_v63 = vsel %vm389_vm8, %v384_v36, %v2265_v3 }
 0x205   : > { %844 = vrot.lane.b32.xlu2 %v2381_v42, %s1567_s15 }
 0x206   : > { %v714_v17 = vadd.f32 %v698_v51, %v478_v27  ;;  %v2407_v27 = vperm.slane %v683_v59, 1  ;;  %v919_v51 = vperm.slane %v2333_v57, 6 }
 0x208   : > { %v2393_v26 = vadd.f32 %v934_v25, %v714_v17  ;;  %v405_v25 = vrot.slane %v2050_v45, 7  ;;  %v675_v17 = vsel %vm303_vm2, %v2399_v30, %v627_v41  ;;  %v2420_v59 = vperm.slane %v919_v51, 2 }
 0x209   : > { %v2389_v48 = vpop.permute.xlu1 %1074  ;;  %v2391_v46 = vpop.permute.xlu0 %834  ;;  %v699_v36 = vmul.f32 %v2407_v27, %v675_v17 }
 0x20a   : > { %2946 = vst [vmem:[#allocation20_spill] sm:$0xff] %v2389_v48  ;;  %v453_v9 = vsel %vm303_vm2, %v2405_v63, %v405_v25 }
 0x20b   : > { %2947 = vst [vmem:[#allocation21_spill] sm:$0xff] %v2393_v26  ;;  %v479_v4 = vmul.f32 %v2415_v55, %v453_v9  ;;  %v247_v9 = vld [vmem:[%s198_s21] sm:$0xff] }
 0x20c   : > { %2948 = vst [vmem:[#allocation22_spill] sm:$0xff] %v2420_v59 }
 0x20d   : > { %1076 = vrot.lane.b32.xlu2 %v2308_v12, %s1567_s15  ;;  %v715_v17 = vadd.f32 %v699_v36, %v479_v4  ;;  %v406_v4 = vrot.slane %v2029_v37, 7  ;;  %v2923_v36 = vrot.slane %v2035_v38, 7 }
 0x20f   : > { %v407_v24 = vsel %vm303_vm2, %v2923_v36, %v406_v4 }
 0x211   : > { %v374_v8 = vpop.permute.xlu1 %373  ;;  %v2423_v45 = vpop.permute.xlu0 %846 }
 0x212   : > { %v2429_v53 = vsel %vm389_vm8, %v843_v19, %v2423_v45  ;;  %v2446_v19 = vmul.f32 0.25, %v247_v9 }
 0x213   : > { %v911_v35 = vsel %vm303_vm2, %v2429_v53, %v2915_v11 }
 0x214   : > { %v935_v51 = vmul.f32 %v2420_v59, %v911_v35  ;;  %v628_v35 = vrot.slane %v2079_v2, 7  ;;  %v680_v9 = vperm.slane %v2446_v19, 1  ;;  %v2950_v59 = vrot.slane %v2087_v16, 7 }
 0x215   : > { %1082 = vrot.lane.b32.xlu2 %v2293_v23, %s1567_s15 }
 0x216   : > { %v2438_v56 = vadd.f32 %v935_v51, %v715_v17  ;;  %v460_v17 = vperm.slane %v2446_v19, 0  ;;  %v629_v40 = vsel %vm303_vm2, %v2950_v59, %v628_v35  ;;  %v2479_v57 = vperm.slane %v680_v9, 1 }
 0x217   : > { %v634_v59 = vrot.slane %v2096_v22, 7 }
 0x218   : > { %2949 = vst [vmem:[#allocation23_spill] sm:$0xff] %v2438_v56  ;;  %v2474_v18 = vperm.slane %v460_v17, 0 }
 0x219   : > { %v2442_v15 = vpop.permute.xlu1 %385  ;;  %v2444_v26 = vpop.permute.xlu0 %377 }
 0x21a   : > { %v2451_v11 = vsel %vm389_vm8, %v374_v8, %v2444_v26  ;;  %v2484_v4 = vsel %vm389_vm8, %v2442_v15, %v374_v8 }
 0x21b   : > { %v2924_v23 = vrot.slane %v2451_v11, 6  ;;  %v2928_v10 = vrot.slane %v2484_v4, 6 }
 0x21d   : > { %v454_v2 = vsel %vm308_vm3, %v407_v24, %v2924_v23  ;;  %v412_v24 = vrot.slane %v2046_v44, 7 }
 0x21e   : > { %v480_v17 = vmul.f32 %v2474_v18, %v454_v2  ;;  %v635_v2 = vsel %vm303_vm2, %v627_v41, %v634_v59  ;;  %v2522_v41 = vsel %vm389_vm8, %v2281_v58, %v2331_v13  ;;  %v917_v59 = vperm.slane %v2446_v19, 6 }
 0x21f   : > { %v413_v8 = vsel %vm303_vm2, %v405_v25, %v412_v24  ;;  %v403_v13 = vrot.slane %v2229_v47, 7 }
 0x220   : > { %v457_v44 = vsel %vm308_vm3, %v413_v8, %v2928_v10  ;;  %v625_v8 = vrot.slane %v2238_v60, 7 }
 0x221   : > { %v597_v56 = vpop.permute.xlu1 %596  ;;  %v2460_v12 = vpop.permute.xlu0 %600  ;;  %v483_v25 = vmul.f32 %v2415_v55, %v457_v44  ;;  %v2530_v44 = vsel %vm389_vm8, %v2250_v5, %v2295_v54  ;;  %v1153_v54 = vperm.slane %v2446_v19, 7 }
 0x222   : > { %v2468_v37 = vsel %vm389_vm8, %v597_v56, %v2460_v12 }
 0x223   : > { %v2929_v51 = vrot.slane %v2468_v37, 6 }
 0x225   : > { %v676_v36 = vsel %vm308_vm3, %v629_v40, %v2929_v51  ;;  %v1097_v51 = vrot.slane %v2260_v34, 7  ;;  %v397_v34 = vsel %vm389_vm8, %v2265_v3, %v2250_v5  ;;  %v864_v5 = vrot.slane %v2136_v39, 7 }
 0x226   : > { %v700_v23 = vmul.f32 %v2479_v57, %v676_v36  ;;  %v2957_v3 = vrot.slane %v2035_v38, 7  ;;  %v2958_v39 = vrot.slane %v2054_v49, 7 }
 0x228   : > { %v2494_v35 = vadd.f32 %v700_v23, %v480_v17  ;;  %v461_v17 = vperm.slane %v2446_v19, 4 }
 0x229   : > { %v2496_v9 = vpop.permute.xlu1 %608 }
 0x22a   : > { %2951 = vst [vmem:[#allocation24_spill] sm:$0xff] %v2494_v35  ;;  %v2502_v40 = vsel %vm389_vm8, %v2496_v9, %v597_v56  ;;  %v681_v56 = vperm.slane %v2446_v19, 5  ;;  %v2543_v60 = vperm.slane %v461_v17, 0  ;;  %v632_v35 = vrot.slane %v2094_v21, 7 }
 0x22b   : > { %v2927_v36 = vrot.slane %v2502_v40, 6  ;;  %v870_v21 = vrot.slane %v2220_v0, 7  ;;  %v1102_v0 = vrot.slane %v2210_v32, 7  ;;  %v2960_v32 = vrot.slane %v2381_v42, 7 }
 0x22c   : > { %v434_v42 = vrot.slane %v2530_v44, 6 }
 0x22d   : > { %v679_v22 = vsel %vm308_vm3, %v635_v2, %v2927_v36  ;;  %v2532_v2 = vperm.slane %v681_v56, 1  ;;  %v451_v56 = vsel %vm303_vm2, %v2530_v44, %v403_v13  ;;  %v2953_v36 = vrot.slane %v2177_v1, 7 }
 0x22e   : > { %v703_v23 = vmul.f32 %v2407_v27, %v679_v22  ;;  %v2538_v22 = vsel %vm389_vm8, %v2391_v46, %v2346_v52  ;;  %v477_v10 = vmul.f32 %v2543_v60, %v451_v56  ;;  %v2568_v1 = vsel %vm389_vm8, %v2329_v33, %v2281_v58 }
 0x22f   : > { %v909_v52 = vsel %vm303_vm2, %v2538_v22, %v2953_v36  ;;  %v408_v33 = vrot.slane %v2162_v62, 7  ;;  %v860_v62 = vrot.slane %v2150_v14, 7  ;;  %v896_v44 = vrot.slane %v2429_v53, 6  ;;  %v2972_v53 = vld [vmem:[#allocation20_spill] sm:$0xff] }
 0x230   : > { %v2514_v24 = vadd.f32 %v703_v23, %v483_v25  ;;  %v673_v25 = vsel %vm303_vm2, %v2522_v41, %v625_v8  ;;  %v2545_v23 = vperm.slane %v917_v59, 2  ;;  %v2559_v59 = vperm.slane %v1153_v54, 3 }
 0x231   : > { %v697_v47 = vmul.f32 %v2532_v2, %v673_v25 }
 0x232   : > { %2952 = vst [vmem:[#allocation25_spill] sm:$0xff] %v2514_v24  ;;  %v933_v17 = vmul.f32 %v2545_v23, %v909_v52  ;;  %v2956_v52 = vrot.slane %v2087_v16, 7 }
 0x233   : > { %v713_v36 = vadd.f32 %v697_v47, %v477_v10  ;;  %v410_v10 = vrot.slane %v2044_v43, 7 }
 0x234   : > { %v672_v47 = vsel %vm303_vm2, %v2568_v1, %v2956_v52 }
 0x235   : > { %v949_v56 = vadd.f32 %v933_v17, %v713_v36  ;;  %v450_v17 = vsel %vm303_vm2, %v397_v34, %v2957_v3  ;;  %v696_v43 = vmul.f32 %v2479_v57, %v672_v47  ;;  %v411_v38 = vsel %vm303_vm2, %v2958_v39, %v410_v10 }
 0x236   : > { %v916_v36 = vperm.slane %v2446_v19, 2  ;;  %v2645_v10 = vsel %vm303_vm2, %v1097_v51, %v1102_v0  ;;  %v438_v3 = vrot.slane %v2405_v63, 6  ;;  %v2963_v0 = vrot.slane %v2451_v11, 6 }
 0x23f   : > { %v2562_v24 = vpop.permute.xlu2 %1070 }
 0x240   : > { %2954 = vst [vmem:[#allocation26_spill] sm:$0xff] %v2562_v24  ;;  %v2574_v25 = vsel %vm389_vm8, %v2562_v24, %v2389_v48  ;;  %v1201_v24 = vld [vmem:[#allocation6 + $0x28] sm:$0xff]  ;;  %v630_v48 = vrot.slane %v2199_v28, 7  ;;  %v409_v28 = vsel %vm303_vm2, %v403_v13, %v408_v33  ;;  %v2623_v13 = vsel %vm303_vm2, %v860_v62, %v864_v5  ;;  %v2642_v33 = vpop.permute.xlu0 %840 }
 0x241   : > { %2955 = vst [vmem:[#allocation27_spill] sm:$0xff] %v2574_v25  ;;  %v1145_v54 = vsel %vm303_vm2, %v2574_v25, %v1097_v51  ;;  %v436_v5 = vrot.slane %v2343_v50, 6  ;;  %v2961_v50 = vrot.slane %v2468_v37, 6 }
 0x242   : > { %v1169_v58 = vmul.f32 %v2559_v59, %v1145_v54  ;;  %v476_v54 = vmul.f32 %v2474_v18, %v450_v17  ;;  %v894_v17 = vrot.slane %v2361_v29, 6 }
 0x244   : > { %v1185_v25 = vadd.f32 %v1169_v58, %v949_v56  ;;  %v631_v56 = vsel %vm303_vm2, %v625_v8, %v630_v48  ;;  %v2959_v58 = vrot.slane %v2104_v6, 7  ;;  %v2629_v6 = vsel %vm389_vm8, %v2423_v45, %v2391_v46 }
 0x245   : > { %v712_v8 = vadd.f32 %v696_v43, %v476_v54  ;;  %v2647_v46 = vperm.slane %v916_v36, 2  ;;  %v908_v47 = vsel %vm303_vm2, %v2629_v6, %v860_v62  ;;  %v658_v43 = vrot.slane %v2366_v31, 6 }
 0x246   : > { %v1217_v16 = vmul.f32 %v1201_v24, %v1185_v25  ;;  %v633_v52 = vsel %vm303_vm2, %v2959_v58, %v632_v35  ;;  %v2613_v24 = vpop.permute.xlu1 %836  ;;  %v440_v35 = vrot.slane %v397_v34, 6  ;;  %v2640_v25 = vsel %vm303_vm2, %v2960_v32, %v870_v21 }
 0x247   : > { %v382_v14 = vpop.permute.xlu2 %381  ;;  %v656_v34 = vrot.slane %v2522_v41, 6  ;;  %v892_v21 = vrot.slane %v2538_v22, 6  ;;  %v932_v39 = vmul.f32 %v2647_v46, %v908_v47  ;;  %v2962_v31 = vrot.slane %v2484_v4, 6 }
 0x248   : > { %1233 = vst [vmem:[%s2599_s9 + $0x28] sm:$0xff] %v1217_v16  ;;  %v2619_v49 = vsel %vm389_vm8, %v2444_v26, %v382_v14  ;;  %v2634_v48 = vsel %vm389_vm8, %v382_v14, %v2442_v15  ;;  %v662_v26 = vrot.slane %v2568_v1, 6  ;;  %v2653_v15 = vsel %vm389_vm8, %v2613_v24, %v2642_v33 }
 0x249   : > { %v431_v45 = vrot.slane %v2619_v49, 6  ;;  %v432_v51 = vrot.slane %v2634_v48, 6  ;;  %v660_v16 = vrot.slane %v2399_v30, 6  ;;  %v889_v41 = vrot.slane %v2653_v15, 6 }
 0x24a   : > { %v657_v63 = vsel %vm308_vm3, %v2961_v50, %v656_v34  ;;  %v441_v30 = vsel %vm308_vm3, %v2962_v31, %v440_v35  ;;  %v435_v32 = vsel %vm308_vm3, %v2963_v0, %v434_v42  ;;  %v693_v35 = vmul.f32 %v2532_v2, %v2468_v37  ;;  %v2964_v37 = vld [vmem:[#allocation18_spill] sm:$0xff] }
 0x24b   : > { %v455_v29 = vsel %vm308_vm3, %v409_v28, %v431_v45  ;;  %v456_v14 = vsel %vm308_vm3, %v411_v38, %v432_v51  ;;  %v437_v28 = vsel %vm308_vm3, %v431_v45, %v436_v5  ;;  %v704_v38 = vmul.f32 %v2479_v57, %v657_v63 }
 0x24c   : > { %v481_v50 = vmul.f32 %v2543_v60, %v455_v29  ;;  %v485_v5 = vmul.f32 %v2543_v60, %v437_v28  ;;  %v2703_v62 = vadd.f32 %v932_v39, %v712_v8  ;;  %v484_v29 = vmul.f32 %v2474_v18, %v435_v32 }
 0x24e   : > { %v720_v39 = vadd.f32 %v704_v38, %v484_v29 }
 0x24f   : > { %v605_v36 = vpop.permute.xlu2 %604 }
 0x250   : > { %v612_v54 = vsel %vm389_vm8, %v605_v36, %v2496_v9  ;;  %v614_v58 = vsel %vm389_vm8, %v2460_v12, %v605_v36  ;;  %v913_v9 = vsel %vm308_vm3, %v2193_v7, %v889_v41  ;;  %v482_v12 = vmul.f32 %v2349_v61, %v456_v14 }
 0x251   : > { %v653_v34 = vrot.slane %v614_v58, 6  ;;  %v654_v47 = vrot.slane %v612_v54, 6  ;;  %v473_v7 = vmul.f32 %v2543_v60, %v2451_v11 }
 0x253   : > { %v659_v36 = vsel %vm308_vm3, %v653_v34, %v658_v43  ;;  %v677_v42 = vsel %vm308_vm3, %v631_v56, %v653_v34  ;;  %v678_v45 = vsel %vm308_vm3, %v633_v52, %v654_v47  ;;  %v692_v56 = vmul.f32 %v2479_v57, %v2502_v40 }
 0x254   : > { %v701_v31 = vmul.f32 %v2532_v2, %v677_v42  ;;  %v702_v0 = vmul.f32 %v2964_v37, %v678_v45  ;;  %v705_v63 = vmul.f32 %v2532_v2, %v659_v36  ;;  %v937_v52 = vmul.f32 %v2545_v23, %v913_v9  ;;  %v2968_v42 = vld [vmem:[#allocation27_spill] sm:$0xff] }
 0x255   : > { %v472_v34 = vmul.f32 %v2474_v18, %v2484_v4  ;;  %v2716_v2 = vmul.f32 %v2415_v55, %v441_v30  ;;  %v709_v8 = vadd.f32 %v693_v35, %v473_v7  ;;  %v661_v32 = vsel %vm308_vm3, %v654_v47, %v660_v16 }
 0x256   : > { %v717_v43 = vadd.f32 %v701_v31, %v481_v50  ;;  %v2711_v14 = vadd.f32 %v702_v0, %v482_v12  ;;  %v721_v28 = vadd.f32 %v705_v63, %v485_v5  ;;  %v694_v57 = vmul.f32 %v2964_v37, %v614_v58  ;;  %v2969_v31 = vld [vmem:[#allocation24_spill] sm:$0xff] }
 0x257   : > { %v833_v11 = vpop.permute.xlu2 %832  ;;  %v2718_v60 = vpop.permute.xlu0 %1072  ;;  %v2965_v18 = vrot.slane %v2502_v40, 6  ;;  %v708_v30 = vadd.f32 %v692_v56, %v472_v34  ;;  %v895_v35 = vsel %vm308_vm3, %v889_v41, %v894_v17  ;;  %v439_v16 = vsel %vm308_vm3, %v432_v51, %v438_v3  ;;  %v2967_v51 = vld [vmem:[#allocation19_spill] sm:$0xff] }
 0x258   : > { %v852_v9 = vsel %vm389_vm8, %v833_v11, %v2613_v24  ;;  %v2725_v50 = vadd.f32 %v937_v52, %v717_v43  ;;  %v474_v58 = vmul.f32 %v2349_v61, %v2619_v49  ;;  %v1152_v47 = vperm.slane %v2446_v19, 3  ;;  %v2966_v24 = vld [vmem:[#allocation17_spill] sm:$0xff] }
 0x259   : > { %v663_v4 = vsel %vm308_vm3, %v2965_v18, %v662_v26  ;;  %v888_v38 = vrot.slane %v852_v9, 6  ;;  %v1154_v12 = vperm.slane %v2966_v24, 3  ;;  %v695_v36 = vmul.f32 %v2407_v27, %v612_v54 }
 0x25a   : > { %v706_v1 = vmul.f32 %v2964_v37, %v661_v32  ;;  %v1155_v26 = vperm.slane %v2966_v24, 7  ;;  %v2744_v17 = vmul.f32 %v2407_v27, %v663_v4  ;;  %v930_v3 = vmul.f32 %v2967_v51, %v2653_v15 }
 0x25b   : > { %v912_v40 = vsel %vm308_vm3, %v2623_v13, %v888_v38  ;;  %v710_v49 = vadd.f32 %v694_v57, %v474_v58  ;;  %v941_v41 = vmul.f32 %v2545_v23, %v895_v35  ;;  %v1128_v54 = vrot.slane %v2968_v42, 6  ;;  %v2970_v57 = vld [vmem:[#allocation22_spill] sm:$0xff] }
 0x25c   : > { %v936_v19 = vmul.f32 %v2647_v46, %v912_v40  ;;  %v475_v45 = vmul.f32 %v2415_v55, %v2634_v48  ;;  %v486_v13 = vmul.f32 %v2349_v61, %v439_v16  ;;  %v893_v27 = vsel %vm308_vm3, %v888_v38, %v892_v21  ;;  %v2971_v35 = vld [vmem:[#allocation10_spill] sm:$0xff] }
 0x25d   : > { %v929_v5 = vmul.f32 %v2545_v23, %v852_v9  ;;  %v2759_v37 = vperm.slane %v1152_v47, 3  ;;  %v2761_v56 = vperm.slane %v1154_v12, 3  ;;  %v2763_v52 = vperm.slane %v1155_v26, 3  ;;  %v2974_v26 = vld [vmem:[#allocation25_spill] sm:$0xff] }
 0x25e   : > { %v952_v15 = vadd.f32 %v936_v19, %v2969_v31  ;;  %v711_v0 = vadd.f32 %v695_v36, %v475_v45  ;;  %v722_v63 = vadd.f32 %v706_v1, %v486_v13  ;;  %v946_v23 = vadd.f32 %v930_v3, %v710_v49  ;;  %v2973_v36 = vld [vmem:[#allocation12_spill] sm:$0xff]  ;;  %v1208_v13 = vld [vmem:[#allocation6 + $0x60] sm:$0x7] }
 0x25f   : > { %v845_v7 = vpop.permute.xlu2 %844  ;;  %v1069_v29 = vpop.permute.xlu1 %1068  ;;  %v940_v48 = vmul.f32 %v2647_v46, %v893_v27  ;;  %v2782_v18 = vadd.f32 %v941_v41, %v721_v28  ;;  %v2975_v27 = vld [vmem:[#allocation14_spill] sm:$0xff] }
 0x260   : > { %v848_v61 = vsel %vm389_vm8, %v2642_v33, %v845_v7  ;;  %v2770_v55 = vsel %vm389_vm8, %v845_v7, %v833_v11  ;;  %v1088_v22 = vsel %vm389_vm8, %v1069_v29, %v2718_v60  ;;  %v2779_v32 = vpop.permute.xlu0 %1078  ;;  %v945_v33 = vadd.f32 %v929_v5, %v709_v8 }
 0x261   : > { %v890_v21 = vrot.slane %v848_v61, 6  ;;  %v891_v43 = vrot.slane %v2770_v55, 6  ;;  %v928_v34 = vmul.f32 %v2647_v46, %v2770_v55  ;;  %v931_v9 = vmul.f32 %v2970_v57, %v848_v61 }
 0x262   : > { %v1124_v11 = vrot.slane %v1088_v22, 6  ;;  %v1165_v16 = vmul.f32 %v2559_v59, %v1088_v22  ;;  %v956_v47 = vadd.f32 %v940_v48, %v720_v39  ;;  %v2976_v5 = vrot.slane %v2975_v27, 7  ;;  %v1206_v27 = vld [vmem:[#allocation6 + $0x50] sm:$0xff] }
 0x263   : > { %v897_v4 = vsel %vm308_vm3, %v890_v21, %v896_v44  ;;  %v914_v38 = vsel %vm308_vm3, %v2971_v35, %v890_v21  ;;  %v915_v46 = vsel %vm308_vm3, %v2640_v25, %v891_v43  ;;  %v1087_v44 = vsel %vm389_vm8, %v2972_v53, %v2779_v32  ;;  %v1202_v21 = vld [vmem:[#allocation6 + $0x30] sm:$0xff] }
 0x264   : > { %v938_v8 = vmul.f32 %v2967_v51, %v914_v38  ;;  %v939_v58 = vmul.f32 %v2970_v57, %v915_v46  ;;  %v942_v28 = vmul.f32 %v2967_v51, %v897_v4  ;;  %v944_v24 = vadd.f32 %v928_v34, %v708_v30  ;;  %v1197_v51 = vld [vmem:[#allocation6 + $0x8] sm:$0xff] }
 0x265   : > { %v1129_v12 = vsel %vm308_vm3, %v1124_v11, %v1128_v54  ;;  %v1148_v25 = vsel %vm308_vm3, %v2973_v36, %v1124_v11  ;;  %v947_v1 = vadd.f32 %v931_v9, %v711_v0  ;;  %v1181_v42 = vadd.f32 %v1165_v16, %v945_v33  ;;  %v1204_v54 = vld [vmem:[#allocation6 + $0x40] sm:$0xff] }
 0x266   : > { %v954_v40 = vadd.f32 %v938_v8, %v2711_v14  ;;  %v955_v3 = vadd.f32 %v939_v58, %v2974_v26  ;;  %v2806_v49 = vadd.f32 %v942_v28, %v722_v63  ;;  %v1172_v19 = vmul.f32 %v2759_v37, %v1148_v25  ;;  %v2978_v58 = vld [vmem:[#allocation16_spill] sm:$0xff]  ;;  %v1205_v25 = vld [vmem:[#allocation6 + $0x48] sm:$0xff] }
 0x267   : > { %v1176_v41 = vmul.f32 %v2759_v37, %v1129_v12  ;;  %v1130_v39 = vrot.slane %v1087_v44, 6  ;;  %v1077_v30 = vpop.permute.xlu2 %1076  ;;  %v1081_v45 = vpop.permute.xlu1 %1080  ;;  %v1146_v14 = vsel %vm303_vm2, %v1087_v44, %v2976_v5  ;;  %v1213_v22 = vmul.f32 %v1197_v51, %v1181_v42  ;;  %v2979_v12 = vld [vmem:[#allocation15_spill] sm:$0xff] }
 0x268   : > { %v1086_v31 = vsel %vm389_vm8, %v2718_v60, %v1077_v30  ;;  %v2818_v0 = vsel %vm389_vm8, %v1077_v30, %v1081_v45  ;;  %v2822_v63 = vsel %vm389_vm8, %v1081_v45, %v1069_v29  ;;  %v1188_v7 = vadd.f32 %v1172_v19, %v952_v15  ;;  %v2977_v29 = vld [vmem:[#allocation21_spill] sm:$0xff]  ;;  %v1198_v15 = vld [vmem:[#allocation6 + $0x10] sm:$0xff]  ;;  %v1209_v26 = vld [vmem:[#allocation6 + $0x68] sm:$0x7] }
 0x269   : > { %v1192_v61 = vadd.f32 %v1176_v41, %v956_v47  ;;  %v1170_v48 = vmul.f32 %v2761_v56, %v1146_v14  ;;  %v1125_v34 = vrot.slane %v1086_v31, 6  ;;  %v1166_v33 = vmul.f32 %v2761_v56, %v1086_v31  ;;  %1229 = vst [vmem:[%s2599_s9 + $0x8] sm:$0xff] %v1213_v22  ;;  %v1199_v45 = vld [vmem:[#allocation6 + $0x18] sm:$0xff] }
 0x26a   : > { %v1126_v60 = vrot.slane %v2818_v0, 6  ;;  %v1127_v9 = vrot.slane %v2822_v63, 6  ;;  %v1220_v11 = vmul.f32 %v1204_v54, %v1188_v7  ;;  %v1164_v38 = vmul.f32 %v2759_v37, %v2822_v63  ;;  %v2981_v63 = vld [vmem:[#allocation26_spill] sm:$0xff] }
 0x26b   : > { %v1224_v4 = vmul.f32 %v1208_v13, %v1192_v61  ;;  %v1186_v35 = vadd.f32 %v1170_v48, %v2977_v29  ;;  %v1131_v46 = vsel %vm308_vm3, %v1125_v34, %v1130_v39  ;;  %v1149_v16 = vsel %vm308_vm3, %v2645_v10, %v1125_v34  ;;  %v1196_v10 = vld [vmem:[#allocation6] sm:$0xff]  ;;  %v2982_v61 = vld [vmem:[#allocation11_spill] sm:$0xff] }
 0x26c   : > { %v1182_v8 = vadd.f32 %v1166_v33, %v946_v23  ;;  %v1150_v28 = vsel %vm308_vm3, %v2978_v58, %v1126_v60  ;;  %1236 = vst [vmem:[%s2599_s9 + $0x40] sm:$0xff] %v1220_v11  ;;  %v1173_v44 = vmul.f32 %v2559_v59, %v1149_v16  ;;  %v1177_v47 = vmul.f32 %v2559_v59, %v1131_v46  ;;  %v1200_v11 = vld [vmem:[#allocation6 + $0x20] sm:$0xff]  ;;  %v2986_v46 = vld [vmem:[#allocation23_spill] sm:$0xff] }
 0x26d   : > { %v1218_v53 = vmul.f32 %v1202_v21, %v1186_v35  ;;  %v1151_v36 = vsel %vm308_vm3, %v2979_v12, %v1127_v9  ;;  %1240 = vst [vmem:[%s2599_s9 + $0x60] sm:$0x7] %v1224_v4  ;;  %v1167_v23 = vmul.f32 %v2763_v52, %v2818_v0  ;;  %v1174_v19 = vmul.f32 %v2761_v56, %v1150_v28  ;;  %v1207_v0 = vld [vmem:[#allocation6 + $0x58] sm:$0xff] }
 0x26e   : > { %v1214_v51 = vmul.f32 %v1198_v15, %v1182_v8  ;;  %v1175_v41 = vmul.f32 %v2763_v52, %v1151_v36  ;;  %v2980_v42 = vrot.slane %v2629_v6, 6  ;;  %v1189_v39 = vadd.f32 %v1173_v44, %v2725_v50  ;;  %v2984_v21 = vld [vmem:[#allocation13_spill] sm:$0xff] }
 0x26f   : > { %1234 = vst [vmem:[%s2599_s9 + $0x30] sm:$0xff] %v1218_v53  ;;  %v1193_v30 = vadd.f32 %v1177_v47, %v2782_v18  ;;  %v1180_v54 = vadd.f32 %v1164_v38, %v944_v24  ;;  %v1083_v13 = vpop.permute.xlu2 %1082  ;;  %v1183_v5 = vadd.f32 %v1167_v23, %v947_v1  ;;  %v1190_v14 = vadd.f32 %v1174_v19, %v954_v40  ;;  %v1203_v4 = vld [vmem:[#allocation6 + $0x38] sm:$0xff]  ;;  %v1210_v38 = vld [vmem:[#allocation6 + $0x70] sm:$0x7] }
 0x270   : > { %v899_v59 = vsel %vm308_vm3, %v891_v43, %v2980_v42  ;;  %1230 = vst [vmem:[%s2599_s9 + $0x10] sm:$0xff] %v1214_v51  ;;  %v1191_v31 = vadd.f32 %v1175_v41, %v955_v3  ;;  %v1085_v6 = vsel %vm389_vm8, %v2779_v32, %v1083_v13  ;;  %v1221_v55 = vmul.f32 %v1205_v25, %v1189_v39  ;;  %v1211_v8 = vld [vmem:[#allocation6 + $0x78] sm:$0x7] }
 0x271   : > { %v1225_v43 = vmul.f32 %v1209_v26, %v1193_v30  ;;  %v1212_v50 = vmul.f32 %v1196_v10, %v1180_v54  ;;  %v1091_v18 = vsel %vm389_vm8, %v1083_v13, %v2981_v63  ;;  %v723_v24 = vadd.f32 %v2744_v17, %v2716_v2 }
 0x272   : > { %v943_v1 = vmul.f32 %v2970_v57, %v899_v59  ;;  %v1215_v40 = vmul.f32 %v1199_v45, %v1183_v5  ;;  %v1132_v3 = vrot.slane %v1085_v6, 6  ;;  %1237 = vst [vmem:[%s2599_s9 + $0x48] sm:$0xff] %v1221_v55  ;;  %v1222_v7 = vmul.f32 %v1206_v27, %v1190_v14 }
 0x273   : > { %v1134_v32 = vrot.slane %v1091_v18, 6  ;;  %v2983_v22 = vrot.slane %v2982_v61, 7  ;;  %v2985_v34 = vrot.slane %v2984_v21, 7  ;;  %1241 = vst [vmem:[%s2599_s9 + $0x68] sm:$0x7] %v1225_v43  ;;  %v1223_v33 = vmul.f32 %v1207_v0, %v1191_v31 }
 0x274   : > { %v1133_v2 = vsel %vm308_vm3, %v1126_v60, %v1132_v3  ;;  %1228 = vst [vmem:[%s2599_s9] sm:$0xff] %v1212_v50  ;;  %v959_v15 = vadd.f32 %v943_v1, %v723_v24 }
 0x275   : > { %v1144_v48 = vsel %vm303_vm2, %v1091_v18, %v2983_v22  ;;  %v1147_v20 = vsel %vm303_vm2, %v1085_v6, %v2985_v34  ;;  %v1135_v29 = vsel %vm308_vm3, %v1127_v9, %v1134_v32  ;;  %v1178_v35 = vmul.f32 %v2761_v56, %v1133_v2  ;;  %1231 = vst [vmem:[%s2599_s9 + $0x18] sm:$0xff] %v1215_v40 }
 0x276   : > { %v1168_v17 = vmul.f32 %v2759_v37, %v1144_v48  ;;  %v1171_v57 = vmul.f32 %v2763_v52, %v1147_v20  ;;  %v1179_v60 = vmul.f32 %v2763_v52, %v1135_v29  ;;  %1238 = vst [vmem:[%s2599_s9 + $0x50] sm:$0xff] %v1222_v7 }
 0x277   : > { %v1194_v58 = vadd.f32 %v1178_v35, %v2806_v49  ;;  %1239 = vst [vmem:[%s2599_s9 + $0x58] sm:$0xff] %v1223_v33 }
 0x278   : > { %v1184_v37 = vadd.f32 %v1168_v17, %v2703_v62  ;;  %v1187_v16 = vadd.f32 %v1171_v57, %v2986_v46  ;;  %v1195_v9 = vadd.f32 %v1179_v60, %v959_v15 }
 0x279   : > { %v1226_v53 = vmul.f32 %v1210_v38, %v1194_v58 }
 0x27a   : > { %v1216_v56 = vmul.f32 %v1200_v11, %v1184_v37  ;;  %v1219_v28 = vmul.f32 %v1203_v4, %v1187_v16  ;;  %v1227_v44 = vmul.f32 %v1211_v8, %v1195_v9 }
 0x27b   : > { %1242 = vst [vmem:[%s2599_s9 + $0x70] sm:$0x7] %v1226_v53 }
 0x27c   : > { %1232 = vst [vmem:[%s2599_s9 + $0x20] sm:$0xff] %v1216_v56 }
 0x27d   : > { %1235 = vst [vmem:[%s2599_s9 + $0x38] sm:$0xff] %v1219_v28 }
 0x27e   : > { %1243 = vst [vmem:[%s2599_s9 + $0x78] sm:$0x7] %v1227_v44 }
 0x27f PF: > { %p16_p3 = scmp.ge.s32.totalorder %s1624_s25, 4   ;;  %s2987_s12 = smov %s1550_s13 }
 0x280   : > { %s2988_s13 = smov %s1554_s14  ;;  %s2989_s14 = smov %s1634_s28 }
 0x281   : > { %s2990_s15 = smov %s1624_s25  ;;  %18 = sbr.rel (!%p16_p3) target bundleno = 5 (0x5), region = 89 }
 0x286   :  { %1265 = vsyncpa [#allocation3], 1 }
 0x287   :  { %1267 = vsyncpa [#allocation3 + $0x1], 1 }
 0x288   :  { %1268 = vsyncpa [#allocation5], 1 }
 0x289   :  { %1270 = vsyncpa [#allocation5 + $0x1], 1 }

</bundles_post_ra>
